<compile_context>
chip_gen: v6e
topology: v6e:2x2x1
jax: 0.10.0
libtpu: 0.0.40
codegen_flags: <defaults>
</compile_context>

<pallas_src>
import functools
import math

import jax
import jax.numpy as jnp
from jax.experimental import pallas as pl
from jax.experimental.pallas import tpu as pltpu

CIN = 4            # input image channels
K36 = 9 * CIN      # full 3x3 im2col contraction dim
CB = 32            # backbone output channels   (meta['backbone_dim'])
DOUT = 16          # dim_reduction out channels (meta['outputdim'])
SH_MAX = 32        # stripe height cap; sweep 32-128 per generation / VMEM budget


def _make_kernel(W, SH):
    """One grid step = SH feature rows of one scale (1-row feature halo)."""
    HEW = (SH + 2) * W          # extended window, lane-flattened (rows*W)
    SHW = SH * W                # central stripe, lane-flattened

    def kernel(x_ref, valid_ref, icnt_ref, lm_ref, rm_ref,
               wconv_ref, bconv_ref, wdim_ref, bdim_ref,
               ws_ref, mm_ref):
        # accumulate directly in the resident output blocks (P3 pattern)
        @pl.when(pl.program_id(1) == 0)
        def _():
            ws_ref[...] = jnp.zeros_like(ws_ref)
            mm_ref[...] = jnp.zeros_like(mm_ref)

        xk = x_ref[0]                      # (36, HEW)  bf16, pre-im2col'd
        valid = valid_ref[0]               # (1, HEW)   f32 row-validity mask

        # ---- backbone: 3x3 conv + ReLU == ONE MXU matmul (K=36, N=HEW) -------
        f = jnp.dot(wconv_ref[...], xk, preferred_element_type=jnp.float32)
        f = jnp.maximum(f + bconv_ref[...], 0.0)                     # (CB, HEW)

        # ---- attention: L2 norm over channels (sublane reduce), central rows -
        fc = f[:, W:W + SHW]                                         # (CB, SHW)
        m = jnp.sqrt(jnp.sum(fc * fc, axis=0, keepdims=True))        # (1, SHW)
        m = m * valid[:, W:W + SHW]

        # ---- dim_reduction first: 1x1 conv commutes exactly with avg_pool2d --
        od = jnp.dot(wdim_ref[...], f.astype(jnp.bfloat16),
                     preferred_element_type=jnp.float32) + bdim_ref[...]
        od = od * valid                                              # (DOUT, HEW)
        # zero rows outside the image == avg_pool2d zero padding (excluded
        # from the count via the precomputed 1/count map below)

        # ---- smoothing: separable 3x3 sum pool, count_include_pad=False ------
        sv = od[:, 0:SHW] + od[:, W:W + SHW] + od[:, 2 * W:2 * W + SHW]
        ssum = (sv
                + lm_ref[...] * pltpu.roll(sv, 1, axis=1)            # x[:, w-1]
                + rm_ref[...] * pltpu.roll(sv, SHW - 1, axis=1))     # x[:, w+1]
        osm = ssum * icnt_ref[0]                                     # (DOUT, SHW)

        # ---- weighted-SPoC running sum + running mask max ---------------------
        ws_ref[...] += jnp.sum(osm * m, axis=1, keepdims=True).reshape(1, DOUT, 1)
        mm_ref[...] = jnp.maximum(
            mm_ref[...], jnp.max(m, axis=1, keepdims=True).reshape(1, 1, 1))

    return kernel


def _blk_bytes(shape, dtype):
    """Padded VMEM footprint of one block (last two dims tiled to (8|16,128))."""
    itemsize = jnp.dtype(dtype).itemsize
    s = tuple(shape) if len(shape) >= 2 else (1,) + tuple(shape)
    lead = 1
    for d in s[:-2]:
        lead *= d
    sub_tile = 8 if itemsize >= 4 else (16 if itemsize == 2 else 32)
    sub = -(-s[-2] // sub_tile) * sub_tile
    lane = -(-s[-1] // 128) * 128
    return lead * sub * lane * itemsize


def _scale_descriptor(xwin, valid, icnt, lmask, rmask, weights, W, SH, ns2):
    """Run the striped kernel over one scale; returns per-core partials."""
    wconv, bconv, wdim, bdim = weights
    HEW, SHW = (SH + 2) * W, SH * W
    kernel = _make_kernel(W, SH)

    stripe = lambda c, j: (c * ns2 + j, 0, 0)     # stripe index = c*ns2 + j
    const2 = lambda c, j: (0, 0)

    in_specs = [
        pl.BlockSpec((1, K36, HEW), stripe),      # im2col stripe window (bf16)
        pl.BlockSpec((1, 1, HEW), stripe),        # row-validity mask
        pl.BlockSpec((1, 1, SHW), stripe),        # 1 / pool count (incl. edges)
        pl.BlockSpec((1, SHW), const2),           # left-neighbour edge mask
        pl.BlockSpec((1, SHW), const2),           # right-neighbour edge mask
        pl.BlockSpec((CB, K36), const2),          # conv weight (bf16, resident)
        pl.BlockSpec((CB, 1), const2),            # conv bias
        pl.BlockSpec((DOUT, CB), const2),         # dim-reduction weight (bf16)
        pl.BlockSpec((DOUT, 1), const2),          # dim-reduction bias
    ]
    out_specs = (pl.BlockSpec((1, DOUT, 1), lambda c, j: (c, 0, 0)),
                 pl.BlockSpec((1, 1, 1), lambda c, j: (c, 0, 0)))
    out_shape = (jax.ShapeDtypeStruct((2, DOUT, 1), jnp.float32),
                 jax.ShapeDtypeStruct((2, 1, 1), jnp.float32))

    blocks = [((1, K36, HEW), jnp.bfloat16), ((1, 1, HEW), jnp.float32),
              ((1, 1, SHW), jnp.float32), ((1, SHW), jnp.float32),
              ((1, SHW), jnp.float32), ((CB, K36), jnp.bfloat16),
              ((CB, 1), jnp.float32), ((DOUT, CB), jnp.bfloat16),
              ((DOUT, 1), jnp.float32), ((1, DOUT, 1), jnp.float32),
              ((1, 1, 1), jnp.float32)]
    est = sum(_blk_bytes(s, d) for s, d in blocks)
    # double-buffered blocks + f32 in-kernel intermediates, capped at v7x's
    # 64 MiB physical VMEM; shrink SH if this cap binds at production widths.
    vmem_limit = int(min(max(6 * est + (8 << 20), 32 << 20), 64 << 20))

    ws, mm = pl.pallas_call(
        kernel,
        grid=(2, ns2),                            # (core split, stripes/core)
        out_shape=out_shape,
        in_specs=in_specs,
        out_specs=out_specs,
        compiler_params=pltpu.CompilerParams(
            dimension_semantics=("parallel", "arbitrary"),
            vmem_limit_bytes=vmem_limit),
    )(xwin, valid, icnt, lmask, rmask, wconv, bconv, wdim, bdim)
    return ws, mm


def _prep_scale(x_hwc, SH):
    """im2col + stripe windowing + mask/count precompute for one scale."""
    H, W, _ = x_hwc.shape
    HE, HEW, SHW = SH + 2, (SH + 2) * W, SH * W
    ns = -(-H // SH)                              # ceil(H / SH)
    ns2 = -(-ns // 2)                             # stripes per core
    NS = 2 * ns2

    # full 3x3 im2col on the tiny CIN=4 input, channels-first, bf16
    xp = jnp.pad(x_hwc, ((1, 1), (1, 1), (0, 0)))                    # (H+2, W+2, CIN)
    cols = [xp[kh:kh + H, kw:kw + W, :] for kh in range(3) for kw in range(3)]
    xim = jnp.transpose(jnp.concatenate(cols, axis=-1), (2, 0, 1))   # (36, H, W)
    # rows padded so stripe i covers feature rows [i*SH-1, i*SH+SH+1)
    xim = jnp.pad(xim, ((0, 0), (1, NS * SH + 1 - H), (0, 0)))       # (36, NS*SH+2, W)
    xwin = jnp.stack([xim[:, i * SH:i * SH + HE, :] for i in range(NS)])
    xwin = xwin.reshape(NS, K36, HEW).astype(jnp.bfloat16)

    # per-stripe row-validity mask over the extended (halo'd) rows
    rows_e = jnp.arange(HE)[None, :] + jnp.arange(NS)[:, None] * SH - 1
    valid = ((rows_e >= 0) & (rows_e < H)).astype(jnp.float32)       # (NS, HE)
    valid = jnp.repeat(valid, W, axis=1).reshape(NS, 1, HEW)

    # 1 / pool-count map (count_include_pad=False), per stripe
    rows = jnp.arange(NS * SH).reshape(NS, SH)
    rc = (jnp.minimum(rows + 2, H) - jnp.maximum(rows - 1, 0)).astype(jnp.float32)
    rc = jnp.where(rows < H, rc, 1.0)             # avoid 0/inf on padded rows
    wi = jnp.arange(W)
    cc = (jnp.minimum(wi + 2, W) - jnp.maximum(wi - 1, 0)).astype(jnp.float32)
    icnt = (1.0 / (rc[:, :, None] * cc[None, None, :])).reshape(NS, 1, SHW)

    # horizontal-neighbour edge masks (grid-invariant)
    lmask = jnp.tile((wi != 0).astype(jnp.float32), SH).reshape(1, SHW)
    rmask = jnp.tile((wi != W - 1).astype(jnp.float32), SH).reshape(1, SHW)
    return xwin, valid, icnt, lmask, rmask, ns2


@functools.partial(jax.jit, static_argnames=("scales",))
def how_forward_global(x_nchw, params, *, scales):
    """HOWNet.forward_global: multi-scale attention-weighted SPoC descriptor."""
    N, C, H0, W0 = x_nchw.shape
    assert N == 1 and C == CIN, "HOW processes one image at a time"
    # weights pre-cast to bf16 once (f32 accumulation in the kernel)
    weights = (params['wconv'].astype(jnp.bfloat16), params['bconv'],
               params['wdim'].astype(jnp.bfloat16), params['bdim'])

    ws_parts, mm_parts = [], []
    for s in scales:
        # scale_image: bilinear, align_corners=False, recompute_scale_factor=True
        Hs, Ws = int(math.floor(H0 * s)), int(math.floor(W0 * s))
        xs = jax.image.resize(x_nchw, (N, C, Hs, Ws), method='bilinear',
                              antialias=False)
        x_hwc = jnp.transpose(xs[0], (1, 2, 0))                      # (Hs, Ws, CIN)
        SH = min(SH_MAX, -(-Hs // 8) * 8)
        xwin, valid, icnt, lmask, rmask, ns2 = _prep_scale(x_hwc, SH)
        ws, mm = _scale_descriptor(xwin, valid, icnt, lmask, rmask,
                                   weights, Ws, SH, ns2)
        ws_parts.append(jnp.sum(ws, axis=0).reshape(DOUT))           # (DOUT,)
        mm_parts.append(jnp.max(mm))
    # features_attentions: masks /= max over all scales  =>  desc = sum(ws) / mx
    mx = jnp.max(jnp.stack(mm_parts))
    desc = (functools.reduce(lambda a, b: a + b, ws_parts) / mx)[None, :]
    # HF.weighted_spoc final step: F.normalize(desc, dim=1)
    norm = jnp.sqrt(jnp.sum(desc * desc, axis=1, keepdims=True))
    return desc / jnp.maximum(norm, 1e-12)


def init_params(key):
    k1, k2, k3, k4 = jax.random.split(key, 4)
    w = jax.random.normal(k1, (3, 3, CIN, CB), jnp.float32) * 0.1    # (kh, kw, cin, cb)
    return {
        # stored (CB, 36) with columns ordered (kh, kw, cin) == im2col order
        'wconv': jnp.transpose(w, (3, 0, 1, 2)).reshape(CB, K36),
        'bconv': jax.random.normal(k2, (CB, 1), jnp.float32) * 0.1,
        # 1x1 conv weight (DOUT, CB, 1, 1) stored as (DOUT, CB)
        'wdim': jax.random.normal(k3, (DOUT, CB), jnp.float32) * 0.1,
        'bdim': jax.random.normal(k4, (DOUT, 1), jnp.float32) * 0.1,
    }


if __name__ == "__main__":
    key = jax.random.PRNGKey(0)
    kx, kp = jax.random.split(key)
    # NCHW input, like the PyTorch module (batch 1, as HOW's forward implies)
    x = jax.random.normal(kx, (1, CIN, 16, 16), jnp.float32)
    params = init_params(kp)
    scales = (1.0, 0.5)            # runtime['training_scales']
    desc = how_forward_global(x, params, scales=scales)
    jax.block_until_ready(desc)
    assert desc.shape == (1, DOUT)
    assert bool(jnp.isfinite(desc).all())
    print("KERNEL_OK")
</pallas_src>

<mosaic_0001>
module attributes {stable_mosaic.version = 11 : i64} {
  func.func @kernel(%arg0: i32, %arg1: i32, %arg2: memref<1x36x288xbf16, #tpu.memory_space<vmem>>, %arg3: memref<1x1x288xf32, #tpu.memory_space<vmem>>, %arg4: memref<1x1x256xf32, #tpu.memory_space<vmem>>, %arg5: memref<1x256xf32, #tpu.memory_space<vmem>>, %arg6: memref<1x256xf32, #tpu.memory_space<vmem>>, %arg7: memref<32x36xbf16, #tpu.memory_space<vmem>>, %arg8: memref<32x1xf32, #tpu.memory_space<vmem>>, %arg9: memref<16x32xbf16, #tpu.memory_space<vmem>>, %arg10: memref<16x1xf32, #tpu.memory_space<vmem>>, %arg11: memref<1x16x1xf32, #tpu.memory_space<vmem>>, %arg12: memref<1x1x1xf32, #tpu.memory_space<vmem>>) attributes {dimension_semantics = [#tpu.dimension_semantics<parallel>, #tpu.dimension_semantics<arbitrary>], iteration_bounds = array<i64: 2, 1>, scalar_prefetch = 0 : i64, scratch_operands = 0 : i64, tpu.core_type = #tpu.core_type<tc>, window_params = [{transform_indices = @transform_0, window_bounds = array<i64: 1, 36, 288>}, {transform_indices = @transform_1, window_bounds = array<i64: 1, 1, 288>}, {transform_indices = @transform_2, window_bounds = array<i64: 1, 1, 256>}, {pipeline_mode = #tpu.pipeline_mode<synchronous>, transform_indices = @transform_3, window_bounds = array<i64: 1, 256>}, {pipeline_mode = #tpu.pipeline_mode<synchronous>, transform_indices = @transform_4, window_bounds = array<i64: 1, 256>}, {pipeline_mode = #tpu.pipeline_mode<synchronous>, transform_indices = @transform_5, window_bounds = array<i64: 32, 36>}, {pipeline_mode = #tpu.pipeline_mode<synchronous>, transform_indices = @transform_6, window_bounds = array<i64: 32, 1>}, {pipeline_mode = #tpu.pipeline_mode<synchronous>, transform_indices = @transform_7, window_bounds = array<i64: 16, 32>}, {pipeline_mode = #tpu.pipeline_mode<synchronous>, transform_indices = @transform_8, window_bounds = array<i64: 16, 1>}, {transform_indices = @transform_9, window_bounds = array<i64: 1, 16, 1>}, {transform_indices = @transform_10, window_bounds = array<i64: 1, 1, 1>}]} {
    %c0_i32 = arith.constant 0 : i32
    %0 = arith.cmpi eq, %arg1, %c0_i32 : i32
    %1 = arith.extui %0 : i1 to i32
    %c0_i32_0 = arith.constant 0 : i32
    %2 = arith.cmpi ne, %1, %c0_i32_0 : i32
    scf.if %2 {
      %cst_38 = arith.constant 0.000000e+00 : f32
      %62 = vector.broadcast %cst_38 : f32 to vector<1x16x1xf32>
      %c0_39 = arith.constant 0 : index
      %c0_40 = arith.constant 0 : index
      %c0_41 = arith.constant 0 : index
      %63 = vector.load %arg11[%c0_39, %c0_40, %c0_41] : memref<1x16x1xf32, #tpu.memory_space<vmem>>, vector<1x16x1xf32>
      tpu.vector_store %arg11[%c0_39, %c0_40, %c0_41], %62 {strides = array<i32>} : memref<1x16x1xf32, #tpu.memory_space<vmem>>, vector<1x16x1xf32>,
      %cst_42 = arith.constant 0.000000e+00 : f32
      %64 = vector.broadcast %cst_42 : f32 to vector<1x1x1xf32>
      %c0_43 = arith.constant 0 : index
      %c0_44 = arith.constant 0 : index
      %c0_45 = arith.constant 0 : index
      %65 = vector.load %arg12[%c0_43, %c0_44, %c0_45] : memref<1x1x1xf32, #tpu.memory_space<vmem>>, vector<1x1x1xf32>
      tpu.vector_store %arg12[%c0_43, %c0_44, %c0_45], %64 {strides = array<i32>} : memref<1x1x1xf32, #tpu.memory_space<vmem>>, vector<1x1x1xf32>,
    } else {
    }
    %c0 = arith.constant 0 : index
    %c0_1 = arith.constant 0 : index
    %c0_2 = arith.constant 0 : index
    %3 = vector.load %arg2[%c0, %c0_1, %c0_2] : memref<1x36x288xbf16, #tpu.memory_space<vmem>>, vector<1x36x288xbf16>
    %4 = vector.shape_cast %3 : vector<1x36x288xbf16> to vector<36x288xbf16>
    %c0_3 = arith.constant 0 : index
    %c0_4 = arith.constant 0 : index
    %c0_5 = arith.constant 0 : index
    %5 = vector.load %arg3[%c0_3, %c0_4, %c0_5] : memref<1x1x288xf32, #tpu.memory_space<vmem>>, vector<1x1x288xf32>
    %6 = vector.shape_cast %5 : vector<1x1x288xf32> to vector<1x288xf32>
    %c0_6 = arith.constant 0 : index
    %c0_7 = arith.constant 0 : index
    %7 = vector.load %arg7[%c0_6, %c0_7] : memref<32x36xbf16, #tpu.memory_space<vmem>>, vector<32x36xbf16>
    %cst = arith.constant dense<0.000000e+00> : vector<32x288xf32>
    %8 = tpu.matmul %7, %4, %cst {dimension_numbers = #tpu.dot_dimension_numbers<[1], [0], [0], [1], [0, 0, 1, 1], [], []>} : vector<32x36xbf16>, vector<36x288xbf16>, vector<32x288xf32> -> vector<32x288xf32>
    %c0_8 = arith.constant 0 : index
    %c0_9 = arith.constant 0 : index
    %9 = vector.load %arg8[%c0_8, %c0_9] : memref<32x1xf32, #tpu.memory_space<vmem>>, vector<32x1xf32>
    %10 = vector.broadcast %9 : vector<32x1xf32> to vector<32x288xf32>
    %11 = arith.addf %8, %10 : vector<32x288xf32>
    %cst_10 = arith.constant 0.000000e+00 : f32
    %12 = vector.broadcast %cst_10 : f32 to vector<32x288xf32>
    %13 = arith.maximumf %11, %12 : vector<32x288xf32>
    %14 = vector.extract_strided_slice %13 {offsets = [0, 16], sizes = [32, 256], strides = [1, 1]} : vector<32x288xf32> to vector<32x256xf32>
    %15 = arith.mulf %14, %14 : vector<32x256xf32>
    %cst_11 = arith.constant dense<0.000000e+00> : vector<256xf32>
    %16 = vector.multi_reduction <add>, %15, %cst_11 [0] : vector<32x256xf32> to vector<256xf32>
    %17 = vector.shape_cast %16 : vector<256xf32> to vector<1x256xf32>
    %18 = math.sqrt %17 : vector<1x256xf32>
    %19 = vector.extract_strided_slice %6 {offsets = [0, 16], sizes = [1, 256], strides = [1, 1]} : vector<1x288xf32> to vector<1x256xf32>
    %20 = arith.mulf %18, %19 : vector<1x256xf32>
    %c0_12 = arith.constant 0 : index
    %c0_13 = arith.constant 0 : index
    %21 = vector.load %arg9[%c0_12, %c0_13] : memref<16x32xbf16, #tpu.memory_space<vmem>>, vector<16x32xbf16>
    %22 = arith.truncf %13 : vector<32x288xf32> to vector<32x288xbf16>
    %cst_14 = arith.constant dense<0.000000e+00> : vector<16x288xf32>
    %23 = tpu.matmul %21, %22, %cst_14 {dimension_numbers = #tpu.dot_dimension_numbers<[1], [0], [0], [1], [0, 0, 1, 1], [], []>} : vector<16x32xbf16>, vector<32x288xbf16>, vector<16x288xf32> -> vector<16x288xf32>
    %c0_15 = arith.constant 0 : index
    %c0_16 = arith.constant 0 : index
    %24 = vector.load %arg10[%c0_15, %c0_16] : memref<16x1xf32, #tpu.memory_space<vmem>>, vector<16x1xf32>
    %25 = vector.broadcast %24 : vector<16x1xf32> to vector<16x288xf32>
    %26 = arith.addf %23, %25 : vector<16x288xf32>
    %27 = vector.broadcast %6 : vector<1x288xf32> to vector<16x288xf32>
    %28 = arith.mulf %26, %27 : vector<16x288xf32>
    %29 = vector.extract_strided_slice %28 {offsets = [0, 0], sizes = [16, 256], strides = [1, 1]} : vector<16x288xf32> to vector<16x256xf32>
    %30 = vector.extract_strided_slice %28 {offsets = [0, 16], sizes = [16, 256], strides = [1, 1]} : vector<16x288xf32> to vector<16x256xf32>
    %31 = arith.addf %29, %30 : vector<16x256xf32>
    %32 = vector.extract_strided_slice %28 {offsets = [0, 32], sizes = [16, 256], strides = [1, 1]} : vector<16x288xf32> to vector<16x256xf32>
    %33 = arith.addf %31, %32 : vector<16x256xf32>
    %c0_17 = arith.constant 0 : index
    %c0_18 = arith.constant 0 : index
    %34 = vector.load %arg5[%c0_17, %c0_18] : memref<1x256xf32, #tpu.memory_space<vmem>>, vector<1x256xf32>
    %c1_i32 = arith.constant 1 : i32
    %35 = tpu.dynamic_rotate %33 by %c1_i32 dim 1 : vector<16x256xf32>, i32 -> vector<16x256xf32>
    %36 = vector.broadcast %34 : vector<1x256xf32> to vector<16x256xf32>
    %37 = arith.mulf %36, %35 : vector<16x256xf32>
    %38 = arith.addf %33, %37 : vector<16x256xf32>
    %c0_19 = arith.constant 0 : index
    %c0_20 = arith.constant 0 : index
    %39 = vector.load %arg6[%c0_19, %c0_20] : memref<1x256xf32, #tpu.memory_space<vmem>>, vector<1x256xf32>
    %c255_i32 = arith.constant 255 : i32
    %40 = tpu.dynamic_rotate %33 by %c255_i32 dim 1 : vector<16x256xf32>, i32 -> vector<16x256xf32>
    %41 = vector.broadcast %39 : vector<1x256xf32> to vector<16x256xf32>
    %42 = arith.mulf %41, %40 : vector<16x256xf32>
    %43 = arith.addf %38, %42 : vector<16x256xf32>
    %c0_21 = arith.constant 0 : index
    %c0_22 = arith.constant 0 : index
    %c0_23 = arith.constant 0 : index
    %44 = vector.load %arg4[%c0_21, %c0_22, %c0_23] : memref<1x1x256xf32, #tpu.memory_space<vmem>>, vector<1x1x256xf32>
    %45 = vector.shape_cast %44 : vector<1x1x256xf32> to vector<1x256xf32>
    %46 = vector.broadcast %45 : vector<1x256xf32> to vector<16x256xf32>
    %47 = arith.mulf %43, %46 : vector<16x256xf32>
    %c0_24 = arith.constant 0 : index
    %c0_25 = arith.constant 0 : index
    %c0_26 = arith.constant 0 : index
    %48 = vector.load %arg11[%c0_24, %c0_25, %c0_26] : memref<1x16x1xf32, #tpu.memory_space<vmem>>, vector<1x16x1xf32>
    %49 = vector.broadcast %20 : vector<1x256xf32> to vector<16x256xf32>
    %50 = arith.mulf %47, %49 : vector<16x256xf32>
    %cst_27 = arith.constant dense<0.000000e+00> : vector<16xf32>
    %51 = vector.multi_reduction <add>, %50, %cst_27 [1] : vector<16x256xf32> to vector<16xf32>
    %52 = vector.shape_cast %51 : vector<16xf32> to vector<16x1xf32>
    %53 = vector.shape_cast %52 : vector<16x1xf32> to vector<1x16x1xf32>
    %54 = arith.addf %48, %53 : vector<1x16x1xf32>
    %c0_28 = arith.constant 0 : index
    %c0_29 = arith.constant 0 : index
    %c0_30 = arith.constant 0 : index
    %55 = vector.load %arg11[%c0_28, %c0_29, %c0_30] : memref<1x16x1xf32, #tpu.memory_space<vmem>>, vector<1x16x1xf32>
    tpu.vector_store %arg11[%c0_28, %c0_29, %c0_30], %54 {strides = array<i32>} : memref<1x16x1xf32, #tpu.memory_space<vmem>>, vector<1x16x1xf32>,
    %c0_31 = arith.constant 0 : index
    %c0_32 = arith.constant 0 : index
    %c0_33 = arith.constant 0 : index
    %56 = vector.load %arg12[%c0_31, %c0_32, %c0_33] : memref<1x1x1xf32, #tpu.memory_space<vmem>>, vector<1x1x1xf32>
    %cst_34 = arith.constant dense<0xFF800000> : vector<1xf32>
    %57 = vector.multi_reduction <maximumf>, %20, %cst_34 [1] : vector<1x256xf32> to vector<1xf32>
    %58 = vector.shape_cast %57 : vector<1xf32> to vector<1x1xf32>
    %59 = vector.shape_cast %58 : vector<1x1xf32> to vector<1x1x1xf32>
    %60 = arith.maximumf %56, %59 : vector<1x1x1xf32>
    %c0_35 = arith.constant 0 : index
    %c0_36 = arith.constant 0 : index
    %c0_37 = arith.constant 0 : index
    %61 = vector.load %arg12[%c0_35, %c0_36, %c0_37] : memref<1x1x1xf32, #tpu.memory_space<vmem>>, vector<1x1x1xf32>
    tpu.vector_store %arg12[%c0_35, %c0_36, %c0_37], %60 {strides = array<i32>} : memref<1x1x1xf32, #tpu.memory_space<vmem>>, vector<1x1x1xf32>,
    return
  }
  func.func @transform_0(%arg0: i32, %arg1: i32) -> (i32, i32, i32) {
    %c1_i32 = arith.constant 1 : i32
    %0 = arith.muli %arg0, %c1_i32 : i32
    %1 = arith.addi %0, %arg1 : i32
    %c0_i32 = arith.constant 0 : i32
    %c0_i32_0 = arith.constant 0 : i32
    %c0_i32_1 = arith.constant 0 : i32
    return %1, %c0_i32, %c0_i32_0 : i32, i32, i32
  }
  func.func @transform_1(%arg0: i32, %arg1: i32) -> (i32, i32, i32) {
    %c1_i32 = arith.constant 1 : i32
    %0 = arith.muli %arg0, %c1_i32 : i32
    %1 = arith.addi %0, %arg1 : i32
    %c0_i32 = arith.constant 0 : i32
    %c0_i32_0 = arith.constant 0 : i32
    %c0_i32_1 = arith.constant 0 : i32
    return %1, %c0_i32, %c0_i32_0 : i32, i32, i32
  }
  func.func @transform_2(%arg0: i32, %arg1: i32) -> (i32, i32, i32) {
    %c1_i32 = arith.constant 1 : i32
    %0 = arith.muli %arg0, %c1_i32 : i32
    %1 = arith.addi %0, %arg1 : i32
    %c0_i32 = arith.constant 0 : i32
    %c0_i32_0 = arith.constant 0 : i32
    %c0_i32_1 = arith.constant 0 : i32
    return %1, %c0_i32, %c0_i32_0 : i32, i32, i32
  }
  func.func @transform_3(%arg0: i32, %arg1: i32) -> (i32, i32) {
    %c0_i32 = arith.constant 0 : i32
    %c0_i32_0 = arith.constant 0 : i32
    %c0_i32_1 = arith.constant 0 : i32
    return %c0_i32, %c0_i32_0 : i32, i32
  }
  func.func @transform_4(%arg0: i32, %arg1: i32) -> (i32, i32) {
    %c0_i32 = arith.constant 0 : i32
    %c0_i32_0 = arith.constant 0 : i32
    %c0_i32_1 = arith.constant 0 : i32
    return %c0_i32, %c0_i32_0 : i32, i32
  }
  func.func @transform_5(%arg0: i32, %arg1: i32) -> (i32, i32) {
    %c0_i32 = arith.constant 0 : i32
    %c0_i32_0 = arith.constant 0 : i32
    %c0_i32_1 = arith.constant 0 : i32
    return %c0_i32, %c0_i32_0 : i32, i32
  }
  func.func @transform_6(%arg0: i32, %arg1: i32) -> (i32, i32) {
    %c0_i32 = arith.constant 0 : i32
    %c0_i32_0 = arith.constant 0 : i32
    %c0_i32_1 = arith.constant 0 : i32
    return %c0_i32, %c0_i32_0 : i32, i32
  }
  func.func @transform_7(%arg0: i32, %arg1: i32) -> (i32, i32) {
    %c0_i32 = arith.constant 0 : i32
    %c0_i32_0 = arith.constant 0 : i32
    %c0_i32_1 = arith.constant 0 : i32
    return %c0_i32, %c0_i32_0 : i32, i32
  }
  func.func @transform_8(%arg0: i32, %arg1: i32) -> (i32, i32) {
    %c0_i32 = arith.constant 0 : i32
    %c0_i32_0 = arith.constant 0 : i32
    %c0_i32_1 = arith.constant 0 : i32
    return %c0_i32, %c0_i32_0 : i32, i32
  }
  func.func @transform_9(%arg0: i32, %arg1: i32) -> (i32, i32, i32) {
    %c0_i32 = arith.constant 0 : i32
    %c0_i32_0 = arith.constant 0 : i32
    %c0_i32_1 = arith.constant 0 : i32
    return %arg0, %c0_i32, %c0_i32_0 : i32, i32, i32
  }
  func.func @transform_10(%arg0: i32, %arg1: i32) -> (i32, i32, i32) {
    %c0_i32 = arith.constant 0 : i32
    %c0_i32_0 = arith.constant 0 : i32
    %c0_i32_1 = arith.constant 0 : i32
    return %arg0, %c0_i32, %c0_i32_0 : i32, i32, i32
  }
}

module attributes {stable_mosaic.version = 11 : i64} {
  func.func @kernel(%arg0: i32, %arg1: i32, %arg2: memref<1x36x80xbf16, #tpu.memory_space<vmem>>, %arg3: memref<1x1x80xf32, #tpu.memory_space<vmem>>, %arg4: memref<1x1x64xf32, #tpu.memory_space<vmem>>, %arg5: memref<1x64xf32, #tpu.memory_space<vmem>>, %arg6: memref<1x64xf32, #tpu.memory_space<vmem>>, %arg7: memref<32x36xbf16, #tpu.memory_space<vmem>>, %arg8: memref<32x1xf32, #tpu.memory_space<vmem>>, %arg9: memref<16x32xbf16, #tpu.memory_space<vmem>>, %arg10: memref<16x1xf32, #tpu.memory_space<vmem>>, %arg11: memref<1x16x1xf32, #tpu.memory_space<vmem>>, %arg12: memref<1x1x1xf32, #tpu.memory_space<vmem>>) attributes {dimension_semantics = [#tpu.dimension_semantics<parallel>, #tpu.dimension_semantics<arbitrary>], iteration_bounds = array<i64: 2, 1>, scalar_prefetch = 0 : i64, scratch_operands = 0 : i64, tpu.core_type = #tpu.core_type<tc>, window_params = [{transform_indices = @transform_0, window_bounds = array<i64: 1, 36, 80>}, {transform_indices = @transform_1, window_bounds = array<i64: 1, 1, 80>}, {transform_indices = @transform_2, window_bounds = array<i64: 1, 1, 64>}, {pipeline_mode = #tpu.pipeline_mode<synchronous>, transform_indices = @transform_3, window_bounds = array<i64: 1, 64>}, {pipeline_mode = #tpu.pipeline_mode<synchronous>, transform_indices = @transform_4, window_bounds = array<i64: 1, 64>}, {pipeline_mode = #tpu.pipeline_mode<synchronous>, transform_indices = @transform_5, window_bounds = array<i64: 32, 36>}, {pipeline_mode = #tpu.pipeline_mode<synchronous>, transform_indices = @transform_6, window_bounds = array<i64: 32, 1>}, {pipeline_mode = #tpu.pipeline_mode<synchronous>, transform_indices = @transform_7, window_bounds = array<i64: 16, 32>}, {pipeline_mode = #tpu.pipeline_mode<synchronous>, transform_indices = @transform_8, window_bounds = array<i64: 16, 1>}, {transform_indices = @transform_9, window_bounds = array<i64: 1, 16, 1>}, {transform_indices = @transform_10, window_bounds = array<i64: 1, 1, 1>}]} {
    %c0_i32 = arith.constant 0 : i32
    %0 = arith.cmpi eq, %arg1, %c0_i32 : i32
    %1 = arith.extui %0 : i1 to i32
    %c0_i32_0 = arith.constant 0 : i32
    %2 = arith.cmpi ne, %1, %c0_i32_0 : i32
    scf.if %2 {
      %cst_38 = arith.constant 0.000000e+00 : f32
      %62 = vector.broadcast %cst_38 : f32 to vector<1x16x1xf32>
      %c0_39 = arith.constant 0 : index
      %c0_40 = arith.constant 0 : index
      %c0_41 = arith.constant 0 : index
      %63 = vector.load %arg11[%c0_39, %c0_40, %c0_41] : memref<1x16x1xf32, #tpu.memory_space<vmem>>, vector<1x16x1xf32>
      tpu.vector_store %arg11[%c0_39, %c0_40, %c0_41], %62 {strides = array<i32>} : memref<1x16x1xf32, #tpu.memory_space<vmem>>, vector<1x16x1xf32>,
      %cst_42 = arith.constant 0.000000e+00 : f32
      %64 = vector.broadcast %cst_42 : f32 to vector<1x1x1xf32>
      %c0_43 = arith.constant 0 : index
      %c0_44 = arith.constant 0 : index
      %c0_45 = arith.constant 0 : index
      %65 = vector.load %arg12[%c0_43, %c0_44, %c0_45] : memref<1x1x1xf32, #tpu.memory_space<vmem>>, vector<1x1x1xf32>
      tpu.vector_store %arg12[%c0_43, %c0_44, %c0_45], %64 {strides = array<i32>} : memref<1x1x1xf32, #tpu.memory_space<vmem>>, vector<1x1x1xf32>,
    } else {
    }
    %c0 = arith.constant 0 : index
    %c0_1 = arith.constant 0 : index
    %c0_2 = arith.constant 0 : index
    %3 = vector.load %arg2[%c0, %c0_1, %c0_2] : memref<1x36x80xbf16, #tpu.memory_space<vmem>>, vector<1x36x80xbf16>
    %4 = vector.shape_cast %3 : vector<1x36x80xbf16> to vector<36x80xbf16>
    %c0_3 = arith.constant 0 : index
    %c0_4 = arith.constant 0 : index
    %c0_5 = arith.constant 0 : index
    %5 = vector.load %arg3[%c0_3, %c0_4, %c0_5] : memref<1x1x80xf32, #tpu.memory_space<vmem>>, vector<1x1x80xf32>
    %6 = vector.shape_cast %5 : vector<1x1x80xf32> to vector<1x80xf32>
    %c0_6 = arith.constant 0 : index
    %c0_7 = arith.constant 0 : index
    %7 = vector.load %arg7[%c0_6, %c0_7] : memref<32x36xbf16, #tpu.memory_space<vmem>>, vector<32x36xbf16>
    %cst = arith.constant dense<0.000000e+00> : vector<32x80xf32>
    %8 = tpu.matmul %7, %4, %cst {dimension_numbers = #tpu.dot_dimension_numbers<[1], [0], [0], [1], [0, 0, 1, 1], [], []>} : vector<32x36xbf16>, vector<36x80xbf16>, vector<32x80xf32> -> vector<32x80xf32>
    %c0_8 = arith.constant 0 : index
    %c0_9 = arith.constant 0 : index
    %9 = vector.load %arg8[%c0_8, %c0_9] : memref<32x1xf32, #tpu.memory_space<vmem>>, vector<32x1xf32>
    %10 = vector.broadcast %9 : vector<32x1xf32> to vector<32x80xf32>
    %11 = arith.addf %8, %10 : vector<32x80xf32>
    %cst_10 = arith.constant 0.000000e+00 : f32
    %12 = vector.broadcast %cst_10 : f32 to vector<32x80xf32>
    %13 = arith.maximumf %11, %12 : vector<32x80xf32>
    %14 = vector.extract_strided_slice %13 {offsets = [0, 8], sizes = [32, 64], strides = [1, 1]} : vector<32x80xf32> to vector<32x64xf32>
    %15 = arith.mulf %14, %14 : vector<32x64xf32>
    %cst_11 = arith.constant dense<0.000000e+00> : vector<64xf32>
    %16 = vector.multi_reduction <add>, %15, %cst_11 [0] : vector<32x64xf32> to vector<64xf32>
    %17 = vector.shape_cast %16 : vector<64xf32> to vector<1x64xf32>
    %18 = math.sqrt %17 : vector<1x64xf32>
    %19 = vector.extract_strided_slice %6 {offsets = [0, 8], sizes = [1, 64], strides = [1, 1]} : vector<1x80xf32> to vector<1x64xf32>
    %20 = arith.mulf %18, %19 : vector<1x64xf32>
    %c0_12 = arith.constant 0 : index
    %c0_13 = arith.constant 0 : index
    %21 = vector.load %arg9[%c0_12, %c0_13] : memref<16x32xbf16, #tpu.memory_space<vmem>>, vector<16x32xbf16>
    %22 = arith.truncf %13 : vector<32x80xf32> to vector<32x80xbf16>
    %cst_14 = arith.constant dense<0.000000e+00> : vector<16x80xf32>
    %23 = tpu.matmul %21, %22, %cst_14 {dimension_numbers = #tpu.dot_dimension_numbers<[1], [0], [0], [1], [0, 0, 1, 1], [], []>} : vector<16x32xbf16>, vector<32x80xbf16>, vector<16x80xf32> -> vector<16x80xf32>
    %c0_15 = arith.constant 0 : index
    %c0_16 = arith.constant 0 : index
    %24 = vector.load %arg10[%c0_15, %c0_16] : memref<16x1xf32, #tpu.memory_space<vmem>>, vector<16x1xf32>
    %25 = vector.broadcast %24 : vector<16x1xf32> to vector<16x80xf32>
    %26 = arith.addf %23, %25 : vector<16x80xf32>
    %27 = vector.broadcast %6 : vector<1x80xf32> to vector<16x80xf32>
    %28 = arith.mulf %26, %27 : vector<16x80xf32>
    %29 = vector.extract_strided_slice %28 {offsets = [0, 0], sizes = [16, 64], strides = [1, 1]} : vector<16x80xf32> to vector<16x64xf32>
    %30 = vector.extract_strided_slice %28 {offsets = [0, 8], sizes = [16, 64], strides = [1, 1]} : vector<16x80xf32> to vector<16x64xf32>
    %31 = arith.addf %29, %30 : vector<16x64xf32>
    %32 = vector.extract_strided_slice %28 {offsets = [0, 16], sizes = [16, 64], strides = [1, 1]} : vector<16x80xf32> to vector<16x64xf32>
    %33 = arith.addf %31, %32 : vector<16x64xf32>
    %c0_17 = arith.constant 0 : index
    %c0_18 = arith.constant 0 : index
    %34 = vector.load %arg5[%c0_17, %c0_18] : memref<1x64xf32, #tpu.memory_space<vmem>>, vector<1x64xf32>
    %c1_i32 = arith.constant 1 : i32
    %35 = tpu.dynamic_rotate %33 by %c1_i32 dim 1 : vector<16x64xf32>, i32 -> vector<16x64xf32>
    %36 = vector.broadcast %34 : vector<1x64xf32> to vector<16x64xf32>
    %37 = arith.mulf %36, %35 : vector<16x64xf32>
    %38 = arith.addf %33, %37 : vector<16x64xf32>
    %c0_19 = arith.constant 0 : index
    %c0_20 = arith.constant 0 : index
    %39 = vector.load %arg6[%c0_19, %c0_20] : memref<1x64xf32, #tpu.memory_space<vmem>>, vector<1x64xf32>
    %c63_i32 = arith.constant 63 : i32
    %40 = tpu.dynamic_rotate %33 by %c63_i32 dim 1 : vector<16x64xf32>, i32 -> vector<16x64xf32>
    %41 = vector.broadcast %39 : vector<1x64xf32> to vector<16x64xf32>
    %42 = arith.mulf %41, %40 : vector<16x64xf32>
    %43 = arith.addf %38, %42 : vector<16x64xf32>
    %c0_21 = arith.constant 0 : index
    %c0_22 = arith.constant 0 : index
    %c0_23 = arith.constant 0 : index
    %44 = vector.load %arg4[%c0_21, %c0_22, %c0_23] : memref<1x1x64xf32, #tpu.memory_space<vmem>>, vector<1x1x64xf32>
    %45 = vector.shape_cast %44 : vector<1x1x64xf32> to vector<1x64xf32>
    %46 = vector.broadcast %45 : vector<1x64xf32> to vector<16x64xf32>
    %47 = arith.mulf %43, %46 : vector<16x64xf32>
    %c0_24 = arith.constant 0 : index
    %c0_25 = arith.constant 0 : index
    %c0_26 = arith.constant 0 : index
    %48 = vector.load %arg11[%c0_24, %c0_25, %c0_26] : memref<1x16x1xf32, #tpu.memory_space<vmem>>, vector<1x16x1xf32>
    %49 = vector.broadcast %20 : vector<1x64xf32> to vector<16x64xf32>
    %50 = arith.mulf %47, %49 : vector<16x64xf32>
    %cst_27 = arith.constant dense<0.000000e+00> : vector<16xf32>
    %51 = vector.multi_reduction <add>, %50, %cst_27 [1] : vector<16x64xf32> to vector<16xf32>
    %52 = vector.shape_cast %51 : vector<16xf32> to vector<16x1xf32>
    %53 = vector.shape_cast %52 : vector<16x1xf32> to vector<1x16x1xf32>
    %54 = arith.addf %48, %53 : vector<1x16x1xf32>
    %c0_28 = arith.constant 0 : index
    %c0_29 = arith.constant 0 : index
    %c0_30 = arith.constant 0 : index
    %55 = vector.load %arg11[%c0_28, %c0_29, %c0_30] : memref<1x16x1xf32, #tpu.memory_space<vmem>>, vector<1x16x1xf32>
    tpu.vector_store %arg11[%c0_28, %c0_29, %c0_30], %54 {strides = array<i32>} : memref<1x16x1xf32, #tpu.memory_space<vmem>>, vector<1x16x1xf32>,
    %c0_31 = arith.constant 0 : index
    %c0_32 = arith.constant 0 : index
    %c0_33 = arith.constant 0 : index
    %56 = vector.load %arg12[%c0_31, %c0_32, %c0_33] : memref<1x1x1xf32, #tpu.memory_space<vmem>>, vector<1x1x1xf32>
    %cst_34 = arith.constant dense<0xFF800000> : vector<1xf32>
    %57 = vector.multi_reduction <maximumf>, %20, %cst_34 [1] : vector<1x64xf32> to vector<1xf32>
    %58 = vector.shape_cast %57 : vector<1xf32> to vector<1x1xf32>
    %59 = vector.shape_cast %58 : vector<1x1xf32> to vector<1x1x1xf32>
    %60 = arith.maximumf %56, %59 : vector<1x1x1xf32>
    %c0_35 = arith.constant 0 : index
    %c0_36 = arith.constant 0 : index
    %c0_37 = arith.constant 0 : index
    %61 = vector.load %arg12[%c0_35, %c0_36, %c0_37] : memref<1x1x1xf32, #tpu.memory_space<vmem>>, vector<1x1x1xf32>
    tpu.vector_store %arg12[%c0_35, %c0_36, %c0_37], %60 {strides = array<i32>} : memref<1x1x1xf32, #tpu.memory_space<vmem>>, vector<1x1x1xf32>,
    return
  }
  func.func @transform_0(%arg0: i32, %arg1: i32) -> (i32, i32, i32) {
    %c1_i32 = arith.constant 1 : i32
    %0 = arith.muli %arg0, %c1_i32 : i32
    %1 = arith.addi %0, %arg1 : i32
    %c0_i32 = arith.constant 0 : i32
    %c0_i32_0 = arith.constant 0 : i32
    %c0_i32_1 = arith.constant 0 : i32
    return %1, %c0_i32, %c0_i32_0 : i32, i32, i32
  }
  func.func @transform_1(%arg0: i32, %arg1: i32) -> (i32, i32, i32) {
    %c1_i32 = arith.constant 1 : i32
    %0 = arith.muli %arg0, %c1_i32 : i32
    %1 = arith.addi %0, %arg1 : i32
    %c0_i32 = arith.constant 0 : i32
    %c0_i32_0 = arith.constant 0 : i32
    %c0_i32_1 = arith.constant 0 : i32
    return %1, %c0_i32, %c0_i32_0 : i32, i32, i32
  }
  func.func @transform_2(%arg0: i32, %arg1: i32) -> (i32, i32, i32) {
    %c1_i32 = arith.constant 1 : i32
    %0 = arith.muli %arg0, %c1_i32 : i32
    %1 = arith.addi %0, %arg1 : i32
    %c0_i32 = arith.constant 0 : i32
    %c0_i32_0 = arith.constant 0 : i32
    %c0_i32_1 = arith.constant 0 : i32
    return %1, %c0_i32, %c0_i32_0 : i32, i32, i32
  }
  func.func @transform_3(%arg0: i32, %arg1: i32) -> (i32, i32) {
    %c0_i32 = arith.constant 0 : i32
    %c0_i32_0 = arith.constant 0 : i32
    %c0_i32_1 = arith.constant 0 : i32
    return %c0_i32, %c0_i32_0 : i32, i32
  }
  func.func @transform_4(%arg0: i32, %arg1: i32) -> (i32, i32) {
    %c0_i32 = arith.constant 0 : i32
    %c0_i32_0 = arith.constant 0 : i32
    %c0_i32_1 = arith.constant 0 : i32
    return %c0_i32, %c0_i32_0 : i32, i32
  }
  func.func @transform_5(%arg0: i32, %arg1: i32) -> (i32, i32) {
    %c0_i32 = arith.constant 0 : i32
    %c0_i32_0 = arith.constant 0 : i32
    %c0_i32_1 = arith.constant 0 : i32
    return %c0_i32, %c0_i32_0 : i32, i32
  }
  func.func @transform_6(%arg0: i32, %arg1: i32) -> (i32, i32) {
    %c0_i32 = arith.constant 0 : i32
    %c0_i32_0 = arith.constant 0 : i32
    %c0_i32_1 = arith.constant 0 : i32
    return %c0_i32, %c0_i32_0 : i32, i32
  }
  func.func @transform_7(%arg0: i32, %arg1: i32) -> (i32, i32) {
    %c0_i32 = arith.constant 0 : i32
    %c0_i32_0 = arith.constant 0 : i32
    %c0_i32_1 = arith.constant 0 : i32
    return %c0_i32, %c0_i32_0 : i32, i32
  }
  func.func @transform_8(%arg0: i32, %arg1: i32) -> (i32, i32) {
    %c0_i32 = arith.constant 0 : i32
    %c0_i32_0 = arith.constant 0 : i32
    %c0_i32_1 = arith.constant 0 : i32
    return %c0_i32, %c0_i32_0 : i32, i32
  }
  func.func @transform_9(%arg0: i32, %arg1: i32) -> (i32, i32, i32) {
    %c0_i32 = arith.constant 0 : i32
    %c0_i32_0 = arith.constant 0 : i32
    %c0_i32_1 = arith.constant 0 : i32
    return %arg0, %c0_i32, %c0_i32_0 : i32, i32, i32
  }
  func.func @transform_10(%arg0: i32, %arg1: i32) -> (i32, i32, i32) {
    %c0_i32 = arith.constant 0 : i32
    %c0_i32_0 = arith.constant 0 : i32
    %c0_i32_1 = arith.constant 0 : i32
    return %arg0, %c0_i32, %c0_i32_0 : i32, i32, i32
  }
}

</mosaic_0001>

<bundles_post_ra>
// kernel: tile.24
= control target key start
LH: loop header
LB: loop body
LE: loop exit
PB: predicated region body
PF: predicated region fallthrough
CT: control target
= control target key end

     0   :  { %s7_s6 = smov 3  ;;  %s21_s9 = smov 3  ;;  %vm4_vm0 = vcmask 130048   ;;  %vm11_vm1 = vcmask 1048448   ;;  %vm18_vm2 = vcmask 917248   ;;  %vm25_vm3 = vcmask 786048   ;;  %s131_s0 = inlined_call_operand.vmem [shape: f32[16,16], index: 0, kind: input, shape index: {}]   ;;  %s132_s1 = inlined_call_operand.vmem [shape: f32[1,256], index: 1, kind: output, shape index: {}]  }
   0x1   :  { %v69_v0 = vld [vmem:[%s131_s0 + $0x7] ss:$8 sm:%s7_s6]   ;;  %s84_s10 = smov 112   ;;  %v71_v1 = vld [vmem:[%s131_s0 + $0x5] ss:$8 sm:%s21_s9]   ;;  %s14_s13 = smov 3 }
   0x2   :  { %9 = vrot.lane.b32.xlu0 %v69_v0, %s84_s10  ;;  %s85_s14 = smov 80   ;;  %v70_v2 = vld [vmem:[%s131_s0 + $0x6] ss:$8 sm:%s14_s13]   ;;  %s28_s17 = smov 3  ;;  %vm32_vm4 = vcmask 654848   ;;  %vm39_vm5 = vcmask 523648  }
   0x3   :  { %23 = vrot.lane.b32.xlu1 %v71_v1, %s85_s14  ;;  %v72_v3 = vld [vmem:[%s131_s0 + $0x4] ss:$8 sm:%s28_s17]   ;;  %s35_s20 = smov 3  ;;  %s42_s21 = smov 3  ;;  %vm46_vm6 = vcmask 392448   ;;  %vm53_vm7 = vcmask 261248  }
   0x4   :  { %s86_s22 = smov 96   ;;  %s87_s23 = smov 64   ;;  %v73_v4 = vld [vmem:[%s131_s0 + $0x3] ss:$8 sm:%s35_s20]   ;;  %v74_v5 = vld [vmem:[%s131_s0 + $0x2] ss:$8 sm:%s42_s21]  }
   0x5   :  { %s2_s26 = smov 3  ;;  %s49_s29 = smov 3 }
   0x6   :  { %16 = vrot.lane.b32.xlu0 %v70_v2, %s86_s22  ;;  %v3_v6 = vld [vmem:[%s131_s0] ss:$8 sm:%s2_s26]   ;;  %s88_s3 = smov 48   ;;  %s89_s4 = smov 32  }
   0x7   :  { %30 = vrot.lane.b32.xlu1 %v72_v3, %s87_s23  ;;  %5 = vst.msk [vmem:[#allocation0] ss:$8 sm:$0x3] %vm4_vm0, %v3_v6   ;;  %v75_v7 = vld [vmem:[%s131_s0 + $0x1] ss:$8 sm:%s49_s29]   ;;  %s90_s0 = smov 16  }
   0xa   :  { %37 = vrot.lane.b32.xlu0 %v73_v4, %s88_s3 }
   0xb   :  { %44 = vrot.lane.b32.xlu1 %v74_v5, %s89_s4 }
   0xe   :  { %51 = vrot.lane.b32.xlu0 %v75_v7, %s90_s0 }
  0x74   :  { %v10_v8 = vpop.permute.xlu0 %9  }
  0x75   :  { %12 = vst.msk [vmem:[#allocation0] ss:$8 sm:$0x3] %vm11_vm1, %v10_v8   ;;  %v24_v9 = vpop.permute.xlu1 %23  }
  0x78   :  { %v17_v10 = vpop.permute.xlu0 %16  }
  0x79   :  { %19 = vst.msk [vmem:[#allocation0] ss:$8 sm:$0x3] %vm18_vm2, %v17_v10   ;;  %v31_v11 = vpop.permute.xlu1 %30  }
  0x7a   :  { %26 = vst.msk [vmem:[#allocation0] ss:$8 sm:$0x3] %vm25_vm3, %v24_v9  }
  0x7b   :  { %33 = vst.msk [vmem:[#allocation0] ss:$8 sm:$0x3] %vm32_vm4, %v31_v11  }
  0x7c   :  { %v38_v12 = vpop.permute.xlu0 %37  }
  0x7d   :  { %40 = vst.msk [vmem:[#allocation0] ss:$8 sm:$0x3] %vm39_vm5, %v38_v12   ;;  %v45_v13 = vpop.permute.xlu1 %44  }
  0x7e   :  { %47 = vst.msk [vmem:[#allocation0] ss:$8 sm:$0x3] %vm46_vm6, %v45_v13  }
  0x80   :  { %v52_v14 = vpop.permute.xlu0 %51  }
  0x81   :  { %54 = vst.msk [vmem:[#allocation0] ss:$8 sm:$0x3] %vm53_vm7, %v52_v14  }
  0x88   :  { %v59_v15 = vld [vmem:[#allocation0] sm:$0x1]  ;;  %v64_v16 = vld [vmem:[#allocation0 + $0x8] sm:$0x1] }
  0x89   :  { %62 = vst [vmem:[%s132_s1] sm:$0x1] %v59_v15  ;;  %76 = vst [vmem:[%s132_s1 + $0x1] sm:$0x1] %v64_v16 }

// kernel: tile.34
= control target key start
LH: loop header
LB: loop body
LE: loop exit
PB: predicated region body
PF: predicated region fallthrough
CT: control target
= control target key end

     0   :  { %s69_s10 = smov 56   ;;  %s70_s11 = smov 40   ;;  %vm3_vm0 = vcmask 64512   ;;  %vm9_vm1 = vcmask 523712   ;;  %vm15_vm2 = vcmask 458112   ;;  %vm21_vm3 = vcmask 392512   ;;  %s113_s0 = inlined_call_operand.vmem [shape: f32[8,8], index: 0, kind: input, shape index: {}]   ;;  %s114_s1 = inlined_call_operand.vmem [shape: f32[1,64], index: 1, kind: output, shape index: {}]  }
   0x1   :  { %v55_v0 = vld [vmem:[%s113_s0 + $0x7] sm:$0x1]   ;;  %v57_v1 = vld [vmem:[%s113_s0 + $0x5] sm:$0x1]   ;;  %v56_v2 = vld [vmem:[%s113_s0 + $0x6] sm:$0x1]  }
   0x2   :  { %7 = vrot.lane.b32.xlu0 %v55_v0, %s69_s10  ;;  %19 = vrot.lane.b32.xlu1 %v57_v1, %s70_s11  ;;  %v58_v3 = vld [vmem:[%s113_s0 + $0x4] sm:$0x1]   ;;  %v2_v4 = vld [vmem:[%s113_s0] sm:$0x1]   ;;  %s71_s18 = smov 48   ;;  %s72_s19 = smov 32  }
   0x3   :  { %4 = vst.msk [vmem:[#allocation0] sm:$0x1] %vm3_vm0, %v2_v4   ;;  %v59_v5 = vld [vmem:[%s113_s0 + $0x3] sm:$0x1]   ;;  %v60_v6 = vld [vmem:[%s113_s0 + $0x2] sm:$0x1]  }
   0x4   :  { %s73_s24 = smov 24   ;;  %s74_s25 = smov 16   ;;  %v61_v7 = vld [vmem:[%s113_s0 + $0x1] sm:$0x1]   ;;  %vm27_vm4 = vcmask 326912   ;;  %vm33_vm5 = vcmask 261312  }
   0x5   :  { %s75_s0 = smov 8   ;;  %vm39_vm6 = vcmask 195712   ;;  %vm45_vm7 = vcmask 130112  }
   0x6   :  { %13 = vrot.lane.b32.xlu0 %v56_v2, %s71_s18  ;;  %25 = vrot.lane.b32.xlu1 %v58_v3, %s72_s19 }
   0xa   :  { %31 = vrot.lane.b32.xlu0 %v59_v5, %s73_s24  ;;  %37 = vrot.lane.b32.xlu1 %v60_v6, %s74_s25 }
   0xe   :  { %43 = vrot.lane.b32.xlu0 %v61_v7, %s75_s0 }
  0x74   :  { %v8_v8 = vpop.permute.xlu0 %7   ;;  %v20_v9 = vpop.permute.xlu1 %19  }
  0x75   :  { %10 = vst.msk [vmem:[#allocation0] sm:$0x1] %vm9_vm1, %v8_v8  }
  0x78   :  { %v14_v10 = vpop.permute.xlu0 %13   ;;  %v26_v11 = vpop.permute.xlu1 %25  }
  0x79   :  { %16 = vst.msk [vmem:[#allocation0] sm:$0x1] %vm15_vm2, %v14_v10  }
  0x7a   :  { %22 = vst.msk [vmem:[#allocation0] sm:$0x1] %vm21_vm3, %v20_v9  }
  0x7b   :  { %28 = vst.msk [vmem:[#allocation0] sm:$0x1] %vm27_vm4, %v26_v11  }
  0x7c   :  { %v32_v12 = vpop.permute.xlu0 %31   ;;  %v38_v13 = vpop.permute.xlu1 %37  }
  0x7d   :  { %34 = vst.msk [vmem:[#allocation0] sm:$0x1] %vm33_vm5, %v32_v12  }
  0x7e   :  { %40 = vst.msk [vmem:[#allocation0] sm:$0x1] %vm39_vm6, %v38_v13  }
  0x80   :  { %v44_v14 = vpop.permute.xlu0 %43  }
  0x81   :  { %46 = vst.msk [vmem:[#allocation0] sm:$0x1] %vm45_vm7, %v44_v14  }
  0x88   :  { %v51_v15 = vld [vmem:[#allocation0] sm:$0x1] }
  0x89   :  { %54 = vst [vmem:[%s114_s1] sm:$0x1] %v51_v15 }

// kernel: how_forward_global.2
= control target key start
LH: loop header
LB: loop body
LE: loop exit
PB: predicated region body
PF: predicated region fallthrough
CT: control target
= control target key end

     0   :  { %s1381_s13 = smov 0   ;;  %s1383_s14 = smov 0   ;;  %s1579_s0 = inlined_call_operand.vmem [shape: bf16[2,36,288], index: 0, kind: input, shape index: {}]   ;;  %s1580_s1 = inlined_call_operand.vmem [shape: f32[2,1,288], index: 1, kind: input, shape index: {}]   ;;  %s1581_s2 = inlined_call_operand.vmem [shape: f32[2,1,256], index: 2, kind: input, shape index: {}]   ;;  %s1582_s3 = inlined_call_operand.vmem [shape: f32[1,256], index: 3, kind: input, shape index: {}]   ;;  %s1583_s4 = inlined_call_operand.vmem [shape: f32[1,256], index: 4, kind: input, shape index: {}]   ;;  %s1584_s5 = inlined_call_operand.vmem [shape: bf16[32,36], index: 5, kind: input, shape index: {}]   ;;  %s1585_s6 = inlined_call_operand.vmem [shape: f32[32,1], index: 6, kind: input, shape index: {}]   ;;  %s1586_s7 = inlined_call_operand.vmem [shape: bf16[16,32], index: 7, kind: input, shape index: {}]   ;;  %s1587_s8 = inlined_call_operand.vmem [shape: f32[16,1], index: 8, kind: input, shape index: {}]   ;;  %s1588_s9 = inlined_call_operand.vmem [shape: f32[2,16,1], index: 9, kind: output, shape index: {0}]   ;;  %s1589_s10 = inlined_call_operand.vmem [shape: f32[2,1,1], index: 10, kind: output, shape index: {1}]  }
   0x1   :  { %s1385_s15 = smov 0  }
   0x2 LB: > { %s33_s16 = sadd.s32 1, %s1313_s14  ;;  %p1186_p0 = scmp.ge.s32.totalorder %s1317_s15, 1  ;;  %s1317_s15 = sphi %s1385_s15, %s21_s15   ;;  %s1313_s14 = sphi %s1383_s14, %s1591_s14   ;;  %s1309_s13 = sphi %s1381_s13, %s1590_s13  }
   0x3   : > { %p35_p1 = scmp.ge.s32.totalorder %s33_s16, 2  ;;  %p357_p2 = scmp.lt.s32.totalorder %s1317_s15, 3 }
   0x5   : > { %s1593_s16 = smov (%p35_p1, %s33_s16), 0  ;;  %p358_p3 = pnand %p1186_p0, %p357_p2 }
   0x6   : > { %p410_p4 = scmp.lt.s32.totalorder (!%p358_p3), %s1309_s13, 1  ;;  %s1322_s27 = smov (!%p358_p3), 112  }
   0x7   : > { %361 = sbr.rel (%p358_p3) target bundleno = 865 (0x361), region = 56  ;;  %s1323_s28 = smov (!%p358_p3), 96  }
   0x8   : > { %s1324_s29 = smov (!%p358_p3), 1  }
   0xc   : > { %v1286_v0 = vld [vmem:[%s1584_s5] sm:$0xff]   ;;  %v1319_v1 = vmov 0   ;;  %vm535_vm0 = vcmask 293888   ;;  %s1595_s13 = smov (!%p410_p4, %s1309_s13), 1  ;;  %v463_v2 = vld [vmem:[%s1585_s6 + $0x10] sm:$0xff]  ;;  %v464_v4 = vld [vmem:[%s1585_s6 + $0x18] sm:$0xff] }
   0xd   : > { %584 = vmatprep.mubr.bf16.mxu0 %v1319_v1  ;;  %1273 = vset.pattern.permute.xlu0 %v1319_v1  ;;  %v461_v3 = vld [vmem:[%s1585_s6] sm:$0xff]  ;;  %s1240_s23 = smul.u32 60, %s1595_s13  ;;  %v462_v5 = vld [vmem:[%s1585_s6 + $0x8] sm:$0xff]  ;;  %vm542_vm1 = vcmask 1041408   ;;  %v1320_v21 = vmov 0.0   ;;  %vm1321_vm2 = vmmov 0  }
   0xe   : > { %1227 = vmatprep.mubr.msk.bf16.mxu1 %vm535_vm0, %v1286_v0  ;;  %1274 = vset.pattern.permute.xlu1 %v1319_v1  ;;  %v763_v11 = vld [vmem:[%s1587_s8] sm:$0xff]  ;;  %v764_v15 = vld [vmem:[%s1587_s8 + $0x8] sm:$0xff]  ;;  %vm678_vm3 = vcmask 1047680   ;;  %vm701_vm4 = vcmask 130048   ;;  %vm780_vm5 = vcmask 261120   ;;  %vm1057_vm12 = vcmask 1040512  }
   0xf   : > { %477 = vperm.xlu0 %1273, %v463_v2   ;;  %467 = vperm.xlu1 %1274, %v461_v3   ;;  %s414_s30 = scalar_lea.vmem %s1579_s0, %s1240_s23  ;;  %v1287_v20 = vld [vmem:[%s1584_s5 + $0x8] sm:$0xff]   ;;  %s1241_s23 = smul.u32 3, %s1595_s13  ;;  %vm1059_vm13 = vcmask 1040384   ;;  %vm1061_vm14 = vcmask 122880   ;;  %vm892_vm15 = vcmask 916480  }
  0x10   : > { %v454_v6 = vld [vmem:[%s414_s30 + $0x30] sm:$0x33]  ;;  %v1276_v8 = vld [vmem:[%s414_s30 + $0x38] ss:$0 sps:$4 sm:$0x33]   ;;  %s1212_s11 = sshll.u32 %s1595_s13, 4 }
  0x11   : > { %v1200_v7 = vcombine.high %v454_v6, %v454_v6  ;;  %v1199_v9 = vcombine.low %v454_v6, %v454_v6  ;;  %v1278_v10 = vld [vmem:[%s414_s30 + $0x1c] ss:$12 sps:$4 sm:$0xff]   ;;  %v1280_v12 = vld [vmem:[%s414_s30 + $0x20] ss:$12 sps:$4 sm:$0xff]   ;;  %1239 = vmatprep.subr.msk.bf16.mxu1 %vm542_vm1, %v1276_v8  ;;  %v550_v14 = vsel %vm542_vm1, %v1276_v8, 0  ;;  %s420_s26 = scalar_lea.vmem %s1580_s1, %s1241_s23  ;;  %s1520_s18 = scalar_lea.vmem %s1588_s9, %s1212_s11 }
  0x12   : > { %1222 = vmatpush3.bf16.msra.mxu1 %v550_v14  ;;  %v1281_v16 = vld [vmem:[%s414_s30 + $0x18] ss:$12 sps:$4 sm:$0xff]   ;;  %v1284_v18 = vld [vmem:[%s414_s30 + $0x8] ss:$12 sps:$4 sm:$0xff]   ;;  %v1285_v19 = vld [vmem:[%s414_s30] ss:$12 sps:$4 sm:$0xff]  }
  0x13   : > { %482 = vperm.xlu0 %1273, %v464_v4   ;;  %472 = vperm.xlu1 %1274, %v462_v5   ;;  %v544_v13 = vsel %vm542_vm1, %v1199_v9, 0  ;;  %v1282_v17 = vld [vmem:[%s414_s30 + $0x4] ss:$12 sps:$4 sm:$0xff]   ;;  %s1325_s30 = smov 127   ;;  %s1188_s23 = sshll.u32 %s1595_s13, 1 }
  0x14   : > { %1202 = vmatprep.subr.msk.bf16.mxu0 %vm542_vm1, %v1200_v7  ;;  %1223 = vmatprep.subr.bf16.mxu1 %v1280_v12  ;;  %vm441_vm1 = vcmask 7168  }
  0x15   : > { %563 = vmatpush1.bf16.msra.mxu0 %v544_v13  ;;  %v1288_v13 = vld [vmem:[%s1586_s7] sm:$0xff]   ;;  %442 = vst.msk [vmem:[%s1520_s18] sm:$0xff] %vm441_vm1, %v1320_v21  ;;  %443 = vst.msk [vmem:[%s1520_s18 + $0x8] sm:$0xff] %vm441_vm1, %v1320_v21 }
  0x16   : > { %564 = vmatprep.subr.bf16.mxu0 %v1278_v10  ;;  %1224 = vmatpush3.bf16.msra.mxu1 %v1280_v12 }
  0x17   : > { %767 = vperm.xlu0 %1273, %v763_v11   ;;  %772 = vperm.xlu1 %1274, %v764_v15  }
  0x18   : > { %1225 = vmatprep.subr.bf16.mxu1 %v1284_v18 }
  0x19   : > { %565 = vmatpush1.bf16.msra.mxu0 %v1281_v16 }
  0x1a   : > { %566 = vmatprep.subr.bf16.mxu0 %v1282_v17  ;;  %1226 = vmatpush3.bf16.msra.mxu1 %v1284_v18 }
  0x1d   : > { %567 = vmatpush1.bf16.msra.mxu0 %v1285_v19  ;;  %1228 = vmatmul.mubr.msk.bf16.vlgmr.msra.gmra.mxu1 %vm535_vm0, %v1287_v20 }
  0x1e   : > { %816 = vmatprep.mubr.bf16.mxu1 %v1319_v1  ;;  %1231 = vmatprep.subr.bf16.mxu0 %v1320_v21 }
  0x20   : > { %1203 = vmatmul.mubr.msk.bf16.vlgmr.msra.gmra.mxu0 %vm535_vm0, %v1286_v0 }
  0x21   : > { %594 = vmatprep.mubr.bf16.mxu0 %v1319_v1 }
  0x28   : > { %1204 = vmatmul.mubr.msk.bf16.gmra.mxu0 %vm535_vm0, %v1287_v20  ;;  %vm917_vm0 = vcmask 785408  }
  0x29   : > { %1235 = vmatprep.mubr.msk.bf16.mxu0 %vm1321_vm2, %v1320_v21 }
  0x8a   : > { %v468_v22 = vpop.permute.xlu1 %467  ;;  %v478_v23 = vpop.permute.xlu0 %477 }
  0x8e   : > { %v473_v33 = vpop.permute.xlu1 %472  ;;  %v483_v36 = vpop.permute.xlu0 %482 }
  0xdd   : > { %v1229_v25 = vpop.f32.mrf.mxu1 }
  0xde   : > { %v648_v27 = vadd.f32 %v1229_v25, %v478_v23 }
  0xdf   : > { %v639_v29 = vpop.f32.mrf.mxu1 }
  0xe0   : > { %v586_v24 = vpop.f32.mrf.mxu0  ;;  %v640_v32 = vadd.f32 %v639_v29, %v468_v22  ;;  %v662_v38 = vmax.f32 %v648_v27, 0.0 }
  0xe1   : > { %v587_v26 = vadd.f32 %v586_v24, %v468_v22  ;;  %v1230_v35 = vpop.f32.mrf.mxu1 }
  0xe2   : > { %v588_v28 = vpop.f32.mrf.mxu0  ;;  %v656_v37 = vmax.f32 %v640_v32, 0.0  ;;  %v651_v40 = vadd.f32 %v1230_v35, %v483_v36  ;;  %v674_v60 = vmul.f32 %v662_v38, %v662_v38 }
  0xe3   : > { %v1435_v30 = vmax.f32 %v587_v26, 0.0  ;;  %v589_v31 = vadd.f32 %v588_v28, %v468_v22  ;;  %v642_v42 = vpop.f32.mrf.mxu1 }
  0xe4   : > { %v590_v34 = vpop.f32.mrf.mxu0  ;;  %v665_v46 = vmax.f32 %v651_v40, 0.0  ;;  %v643_v48 = vadd.f32 %v642_v42, %v473_v33  ;;  %v668_v50 = vmul.f32 %v656_v37, %v656_v37  ;;  %v705_v18 = vsel %vm701_vm4, %v674_v60, 0.0 }
  0xe5   : > { %v591_v39 = vadd.f32 %v590_v34, %v473_v33  ;;  %v666_v43 = vmul.f32 %v1435_v30, %v1435_v30  ;;  %v1439_v44 = vmax.f32 %v589_v31, 0.0 }
  0xe6   : > { %v592_v41 = vpop.f32.mrf.mxu0  ;;  %v762_v53 = vpack.c.bf16 %v665_v46, %v662_v38  ;;  %v659_v56 = vmax.f32 %v643_v48, 0.0  ;;  %v702_v0 = vsel %vm701_vm4, %v668_v50, 0.0  ;;  %v677_v9 = vmul.f32 %v665_v46, %v665_v46 }
  0xe7   : > { %v1441_v45 = vmax.f32 %v591_v39, 0.0  ;;  %v593_v47 = vadd.f32 %v592_v41, %v473_v33  ;;  %v679_v59 = vsel %vm678_vm3, %v666_v43, 0.0  ;;  %v667_v61 = vmul.f32 %v1439_v44, %v1439_v44 }
  0xe8   : > { %v596_v49 = vpop.f32.mrf.mxu0  ;;  %1232 = vmatpush3.bf16.msra.mxu0 %v762_v53  ;;  %v671_v3 = vmul.f32 %v659_v56, %v659_v56  ;;  %v759_v4 = vpack.c.bf16 %v659_v56, %v656_v37  ;;  %v707_v25 = vsel %vm701_vm4, %v677_v9, 0.0  ;;  %v456_v56 = vld [vmem:[%s420_s26] sm:$0x7]  ;;  %s426_s26 = scalar_lea.vmem %s1581_s2, %s1188_s23 }
  0xe9   : > { %v597_v51 = vadd.f32 %v596_v49, %v478_v23  ;;  %v669_v52 = vmul.f32 %v1441_v45, %v1441_v45  ;;  %v658_v55 = vmax.f32 %v593_v47, 0.0  ;;  %1233 = vmatprep.subr.bf16.mxu0 %v1320_v21  ;;  %v757_v38 = vpack.c.bf16 %v1441_v45, %v1435_v30 }
  0xea   : > { %v598_v54 = vpop.f32.mrf.mxu0  ;;  %v703_v11 = vsel %vm701_vm4, %v671_v3, 0.0  ;;  %v737_v30 = vlaneseq  ;;  %vm444_vm4 = vcmask 0  }
  0xeb   : > { %v660_v57 = vmax.f32 %v597_v51, 0.0  ;;  %v599_v58 = vadd.f32 %v598_v54, %v478_v23  ;;  %v680_v62 = vsel %vm678_vm3, %v669_v52, 0.0  ;;  %v670_v2 = vmul.f32 %v658_v55, %v658_v55 }
  0xec   : > { %v600_v63 = vpop.f32.mrf.mxu0  ;;  %v681_v1 = vadd.f32 %v680_v62, %v679_v59  ;;  %v704_v14 = vadd.f32 %v703_v11, %v702_v0  ;;  %1234 = vmatpush3.bf16.msra.mxu0 %v759_v4  ;;  %v758_v32 = vpack.c.bf16 %v658_v55, %v1439_v44  ;;  %v738_v45 = vshrl.u32 %v737_v30, 7 }
  0xed   : > { %v672_v5 = vmul.f32 %v660_v57, %v660_v57  ;;  %v661_v6 = vmax.f32 %v599_v58, 0.0  ;;  %v601_v7 = vadd.f32 %v600_v63, %v483_v36  ;;  %v692_v10 = vadd.f32 %v670_v2, %v667_v61 }
  0xee   : > { %v602_v8 = vpop.f32.mrf.mxu0  ;;  %v706_v22 = vadd.f32 %v705_v18, %v704_v14  ;;  %v747_v55 = vsub.s32 2, %v738_v45  ;;  %v1471_v58 = vsub.s32 1, %v738_v45 }
  0xef   : > { %v603_v12 = vadd.f32 %v602_v8, %v483_v36  ;;  %v682_v15 = vsel %vm678_vm3, %v672_v5, 0.0  ;;  %v673_v16 = vmul.f32 %v661_v6, %v661_v6  ;;  %v663_v17 = vmax.f32 %v601_v7, 0.0  ;;  %1236 = vmatmul.mubr.msk.bf16.vlgmr.msra.gmra.mxu0 %vm780_vm5, %v1288_v13 }
  0xf0   : > { %v683_v19 = vadd.f32 %v682_v15, %v681_v1  ;;  %v708_v28 = vadd.f32 %v707_v25, %v706_v22  ;;  %v748_v60 = vrot.slane %v456_v56, %v747_v55  ;;  %v744_v63 = vrot.slane %v456_v56, %v1471_v58  ;;  %v768_v22 = vpop.permute.xlu0 %767 }
  0xf1   : > { %v664_v20 = vmax.f32 %v603_v12, 0.0  ;;  %v693_v23 = vadd.f32 %v692_v10, %v673_v16  ;;  %v675_v24 = vmul.f32 %v663_v17, %v663_v17  ;;  %v760_v31 = vpack.c.bf16 %v663_v17, %v660_v57 }
  0xf2   : > { %v709_v35 = vrot.slane %v708_v28, 4  ;;  %v1469_v57 = vsub.s32 0, %v738_v45 }
  0xf3   : > { %v676_v26 = vmul.f32 %v664_v20, %v664_v20  ;;  %v761_v27 = vpack.c.bf16 %v664_v20, %v661_v6  ;;  %v684_v29 = vsel %vm678_vm3, %v675_v24, 0.0 }
  0xf4   : > { %v685_v33 = vadd.f32 %v684_v29, %v683_v19  ;;  %v710_v39 = vadd.f32 %v709_v35, %v708_v28  ;;  %v740_v62 = vrot.slane %v456_v56, %v1469_v57 }
  0xf5   : > { %v694_v34 = vadd.f32 %v693_v23, %v676_v26  ;;  %796 = vmatprep.subr.bf16.mxu1 %v761_v27  ;;  %v773_v27 = vpop.permute.xlu1 %772 }
  0xf6   : > { %797 = vmatpush1.bf16.msra.mxu1 %v760_v31  ;;  %v686_v36 = vrot.slane %v685_v33, 4  ;;  %v711_v42 = vrot.slane %v710_v39, 2 }
  0xf7   : > { %v695_v37 = vrot.slane %v694_v34, 4  ;;  %798 = vmatprep.subr.bf16.mxu1 %v758_v32 }
  0xf8   : > { %v687_v40 = vadd.f32 %v686_v36, %v685_v33  ;;  %v712_v44 = vadd.f32 %v711_v42, %v710_v39 }
  0xf9   : > { %v696_v41 = vadd.f32 %v695_v37, %v694_v34 }
  0xfa   : > { %799 = vmatpush1.bf16.msra.mxu1 %v757_v38  ;;  %v688_v43 = vrot.slane %v687_v40, 2  ;;  %v713_v49 = vrot.slane %v712_v44, 1 }
  0xfb   : > { %v697_v46 = vrot.slane %v696_v41, 2 }
  0xfc   : > { %v689_v47 = vadd.f32 %v688_v43, %v687_v40  ;;  %v714_v52 = vadd.f32 %v713_v49, %v712_v44 }
  0xfd   : > { %v698_v48 = vadd.f32 %v697_v46, %v696_v41  ;;  %1208 = vmatmul.mubr.msk.bf16.vlgmr.msra.gmra.mxu1 %vm780_vm5, %v1288_v13 }
  0xfe   : > { %v690_v50 = vrot.slane %v689_v47, 1  ;;  %1289 = vrsqrt.f32 %v714_v52  ;;  %vm731_vm6 = vcmp.eq.f32.partialorder %v714_v52, inf  ;;  %vm733_vm8 = vcmp.eq.f32.partialorder %v714_v52, 0.0 }
  0xff   : > { %v699_v51 = vrot.slane %v698_v48, 1  ;;  %v734_v3 = vand.u32 2147483648, %v714_v52 }
 0x100   : > { %v691_v53 = vadd.f32 %v690_v50, %v689_v47 }
 0x101   : > { %v700_v54 = vadd.f32 %v699_v51, %v698_v48 }
 0x102   : > { %1291 = vrsqrt.f32 %v691_v53  ;;  %vm717_vm7 = vcmp.eq.f32.partialorder %v691_v53, inf  ;;  %vm719_vm9 = vcmp.eq.f32.partialorder %v691_v53, 0.0  ;;  %v720_v4 = vand.u32 2147483648, %v691_v53 }
 0x103   : > { %1293 = vrsqrt.f32 %v700_v54  ;;  %vm724_vm10 = vcmp.eq.f32.partialorder %v700_v54, inf  ;;  %v727_v9 = vand.u32 2147483648, %v700_v54  ;;  %vm726_vm11 = vcmp.eq.f32.partialorder %v700_v54, 0.0 }
 0x10b   : > { %v1290_v59 = vpop.eup %1289 }
 0x10c   : > { %v730_v0 = vmul.f32 %v1290_v59, %v714_v52 }
 0x10e   : > { %v732_v5 = vsel %vm731_vm6, %v714_v52, %v730_v0 }
 0x10f   : > { %v1292_v61 = vpop.eup %1291  ;;  %v735_v8 = vsel %vm733_vm8, %v734_v3, %v732_v5 }
 0x110   : > { %v1294_v1 = vpop.eup %1293  ;;  %v716_v2 = vmul.f32 %v1292_v61, %v691_v53  ;;  %v1477_v14 = vmul.f32 %v748_v60, %v735_v8 }
 0x111   : > { %v723_v6 = vmul.f32 %v1294_v1, %v700_v54 }
 0x112   : > { %v718_v7 = vsel %vm717_vm7, %v691_v53, %v716_v2  ;;  %v1062_v19 = vsel %vm1061_vm14, %v1477_v14, -inf }
 0x113   : > { %v721_v10 = vsel %vm719_vm9, %v720_v4, %v718_v7  ;;  %v725_v11 = vsel %vm724_vm10, %v700_v54, %v723_v6 }
 0x114   : > { %v1475_v12 = vmul.f32 %v740_v62, %v721_v10  ;;  %v728_v13 = vsel %vm726_vm11, %v727_v9, %v725_v11 }
 0x115   : > { %v1479_v15 = vmul.f32 %v744_v63, %v728_v13  ;;  %v1027_v13 = vrot.slane %v1477_v14, %v1469_v57  ;;  %v940_v14 = vand.u32 127, %v737_v30 }
 0x116   : > { %v1058_v16 = vsel %vm1057_vm12, %v1475_v12, -inf  ;;  %v1019_v11 = vrot.slane %v1475_v12, %v1469_v57 }
 0x117   : > { %v1060_v17 = vsel %vm1059_vm13, %v1479_v15, -inf  ;;  %vm941_vm2 = vcmp.lt.s32.totalorder %v940_v14, 1  ;;  %vm974_vm3 = vcmp.lt.s32.totalorder %v940_v14, 127 }
 0x118   : > { %v1063_v18 = vmax.f32 %v1058_v16, %v1060_v17  ;;  %v1023_v16 = vrot.slane %v1479_v15, %v1469_v57  ;;  %v930_v17 = vld [vmem:[%s1582_s3] sm:$0x3] }
 0x11a   : > { %v1484_v20 = vmax.f32 %v1063_v18, %v1062_v19 }
 0x1af   : > { %v861_v23 = vpop.f32.mrf.mxu0 }
 0x1b0   : > { %v862_v24 = vadd.f32 %v861_v23, %v768_v22  ;;  %v950_v23 = vrot.slane %v930_v17, %v1469_v57 }
 0x1b1   : > { %v1237_v25 = vpop.f32.mrf.mxu0 }
 0x1b2   : > { %v870_v26 = vmul.f32 %v862_v24, %v748_v60  ;;  %v954_v24 = vrot.slane %v930_v17, %v1471_v58 }
 0x1b3   : > { %v864_v28 = vpop.f32.mrf.mxu0 }
 0x1b4   : > { %v865_v29 = vadd.f32 %v864_v28, %v773_v27  ;;  %884 = vrot.lane.b32.xlu0 %v870_v26, %s1322_s27 }
 0x1b5   : > { %v1238_v31 = vpop.f32.mrf.mxu0 }
 0x1b6   : > { %v873_v32 = vmul.f32 %v865_v29, %v748_v60 }
 0x1b8   : > { %909 = vrot.lane.b32.xlu0 %v870_v26, %s1323_s28  ;;  %890 = vrot.lane.b32.xlu1 %v873_v32, %s1322_s27 }
 0x1bd   : > { %v818_v33 = vpop.f32.mrf.mxu1 }
 0x1be   : > { %v819_v34 = vadd.f32 %v818_v33, %v768_v22 }
 0x1bf   : > { %v820_v35 = vpop.f32.mrf.mxu1 }
 0x1c0   : > { %v868_v36 = vmul.f32 %v819_v34, %v740_v62  ;;  %v821_v37 = vadd.f32 %v820_v35, %v768_v22  ;;  %v965_v22 = vld [vmem:[%s1583_s4] sm:$0x3] }
 0x1c1   : > { %v822_v38 = vpop.f32.mrf.mxu1  ;;  %v987_v28 = vrot.slane %v965_v22, %v1471_v58 }
 0x1c2   : > { %v869_v39 = vmul.f32 %v821_v37, %v744_v63  ;;  %880 = vrot.lane.b32.xlu0 %v868_v36, %s1322_s27  ;;  %v823_v42 = vadd.f32 %v822_v38, %v773_v27 }
 0x1c3   : > { %v824_v40 = vpop.f32.mrf.mxu1 }
 0x1c4   : > { %v825_v41 = vadd.f32 %v824_v40, %v773_v27  ;;  %882 = vrot.lane.b32.xlu1 %v869_v39, %s1322_s27  ;;  %v871_v46 = vmul.f32 %v823_v42, %v740_v62  ;;  %v983_v27 = vrot.slane %v965_v22, %v1469_v57  ;;  %v998_v40 = vld [vmem:[%s426_s26] sm:$0x3] }
 0x1c6   : > { %905 = vrot.lane.b32.xlu0 %v868_v36, %s1323_s28  ;;  %v872_v43 = vmul.f32 %v825_v41, %v744_v63 }
 0x1c8   : > { %907 = vrot.lane.b32.xlu1 %v869_v39, %s1323_s28 }
 0x1ca   : > { %888 = vrot.lane.b32.xlu0 %v872_v43, %s1322_s27 }
 0x1cc   : > { %886 = vrot.lane.b32.xlu1 %v871_v46, %s1322_s27 }
 0x1ce   : > { %913 = vrot.lane.b32.xlu0 %v872_v43, %s1323_s28 }
 0x1d0   : > { %911 = vrot.lane.b32.xlu1 %v871_v46, %s1323_s28 }
 0x1d4   : > { %915 = vrot.lane.b32.xlu1 %v873_v32, %s1323_s28 }
 0x226   : > { %v885_v44 = vpop.permute.xlu0 %884 }
 0x22a   : > { %v910_v47 = vpop.permute.xlu0 %909  ;;  %v891_v48 = vpop.permute.xlu1 %890 }
 0x234   : > { %v881_v49 = vpop.permute.xlu0 %880 }
 0x236   : > { %v883_v50 = vpop.permute.xlu1 %882 }
 0x237   : > { %v893_v51 = vsel %vm892_vm15, %v881_v49, %v883_v50  ;;  %v894_v45 = vsel %vm892_vm15, %v883_v50, %v885_v44  ;;  %v1003_v50 = vrot.slane %v998_v40, %v1469_v57 }
 0x238   : > { %v906_v52 = vpop.permute.xlu0 %905  ;;  %v901_v53 = vadd.f32 %v893_v51, %v868_v36  ;;  %v902_v61 = vadd.f32 %v894_v45, %v869_v39  ;;  %v1007_v51 = vrot.slane %v998_v40, %v1471_v58 }
 0x23a   : > { %v908_v54 = vpop.permute.xlu1 %907 }
 0x23b   : > { %v918_v55 = vsel %vm917_vm0, %v906_v52, %v908_v54  ;;  %v919_v60 = vsel %vm917_vm0, %v908_v54, %v910_v47 }
 0x23c   : > { %v1495_v56 = vadd.f32 %v918_v55, %v901_v53  ;;  %v889_v59 = vpop.permute.xlu0 %888  ;;  %v927_v0 = vadd.f32 %v919_v60, %v902_v61 }
 0x23d   : > { %v896_v4 = vsel %vm892_vm15, %v889_v59, %v891_v48 }
 0x23e   : > { %v887_v62 = vpop.permute.xlu1 %886  ;;  %931 = vrot.lane.b32.xlu0 %v1495_v56, %s1324_s29  ;;  %v904_v7 = vadd.f32 %v896_v4, %v872_v43 }
 0x23f   : > { %v895_v63 = vsel %vm892_vm15, %v887_v62, %v889_v59 }
 0x240   : > { %v903_v1 = vadd.f32 %v895_v63, %v871_v46  ;;  %v914_v2 = vpop.permute.xlu0 %913 }
 0x242   : > { %v912_v3 = vpop.permute.xlu1 %911  ;;  %935 = vrot.lane.b32.xlu0 %v927_v0, %s1324_s29 }
 0x243   : > { %v920_v5 = vsel %vm917_vm0, %v912_v3, %v914_v2 }
 0x244   : > { %v1502_v6 = vadd.f32 %v920_v5, %v903_v1 }
 0x246   : > { %v916_v8 = vpop.permute.xlu1 %915  ;;  %966 = vrot.lane.b32.xlu0 %v1495_v56, %s1325_s30  ;;  %933 = vrot.lane.b32.xlu1 %v1502_v6, %s1324_s29 }
 0x247   : > { %v921_v9 = vsel %vm917_vm0, %v914_v2, %v916_v8 }
 0x248   : > { %v929_v10 = vadd.f32 %v921_v9, %v904_v7  ;;  %v1014_v9 = vld [vmem:[%s1520_s18] sm:$0xff] }
 0x24a   : > { %970 = vrot.lane.b32.xlu0 %v927_v0, %s1325_s30  ;;  %937 = vrot.lane.b32.xlu1 %v929_v10, %s1324_s29  ;;  %s435_s29 = scalar_lea.vmem %s1589_s10, %s1595_s13 }
 0x24b   : > { %445 = vst.msk [vmem:[%s435_s29] sm:$0x1] %vm444_vm4, %v1320_v21 }
 0x24e   : > { %968 = vrot.lane.b32.xlu1 %v1502_v6, %s1325_s30  ;;  %1031 = vrot.lane.b32.xlu0 %v1019_v11, %s1322_s27  ;;  %v1015_v11 = vld [vmem:[%s1520_s18 + $0x8] sm:$0xff] }
 0x252   : > { %972 = vrot.lane.b32.xlu1 %v929_v10, %s1325_s30  ;;  %1035 = vrot.lane.b32.xlu0 %v1027_v13, %s1322_s27  ;;  %v1056_v14 = vld [vmem:[%s435_s29] sm:$0x1] }
 0x256   : > { %1033 = vrot.lane.b32.xlu1 %v1023_v16, %s1322_s27 }
 0x2b0   : > { %v932_v12 = vpop.permute.xlu0 %931 }
 0x2b4   : > { %v936_v15 = vpop.permute.xlu0 %935 }
 0x2b5   : > { %v942_v25 = vsel %vm941_vm2, %v932_v12, %v936_v15  ;;  %v944_v30 = vsel %vm941_vm2, %v936_v15, %v932_v12 }
 0x2b6   : > { %v957_v33 = vmul.f32 %v950_v23, %v944_v30  ;;  %v958_v34 = vmul.f32 %v954_v24, %v942_v25 }
 0x2b8   : > { %v934_v18 = vpop.permute.xlu1 %933  ;;  %v967_v19 = vpop.permute.xlu0 %966  ;;  %v961_v41 = vadd.f32 %v957_v33, %v1495_v56  ;;  %v962_v42 = vadd.f32 %v958_v34, %v927_v0 }
 0x2bc   : > { %v938_v26 = vpop.permute.xlu1 %937  ;;  %v971_v29 = vpop.permute.xlu0 %970 }
 0x2bd   : > { %v975_v31 = vsel %vm974_vm3, %v967_v19, %v971_v29  ;;  %v977_v32 = vsel %vm974_vm3, %v971_v29, %v967_v19  ;;  %v943_v35 = vsel %vm941_vm2, %v934_v18, %v938_v26  ;;  %v945_v36 = vsel %vm941_vm2, %v938_v26, %v934_v18 }
 0x2be   : > { %v990_v37 = vmul.f32 %v983_v27, %v975_v31  ;;  %v991_v38 = vmul.f32 %v987_v28, %v977_v32  ;;  %v959_v43 = vmul.f32 %v950_v23, %v945_v36  ;;  %v960_v46 = vmul.f32 %v954_v24, %v943_v35 }
 0x2c0   : > { %v969_v39 = vpop.permute.xlu1 %968  ;;  %v1032_v44 = vpop.permute.xlu0 %1031  ;;  %v994_v47 = vadd.f32 %v990_v37, %v961_v41  ;;  %v995_v48 = vadd.f32 %v991_v38, %v962_v42  ;;  %v963_v54 = vadd.f32 %v959_v43, %v1502_v6  ;;  %v964_v45 = vadd.f32 %v960_v46, %v929_v10 }
 0x2c2   : > { %v1010_v63 = vmul.f32 %v1003_v50, %v994_v47  ;;  %v1011_v0 = vmul.f32 %v1007_v51, %v995_v48 }
 0x2c4   : > { %v973_v49 = vpop.permute.xlu1 %972  ;;  %v1036_v61 = vpop.permute.xlu0 %1035 }
 0x2c5   : > { %v976_v52 = vsel %vm974_vm3, %v969_v39, %v973_v49  ;;  %v978_v53 = vsel %vm974_vm3, %v973_v49, %v969_v39 }
 0x2c6   : > { %v992_v55 = vmul.f32 %v983_v27, %v976_v52  ;;  %v993_v56 = vmul.f32 %v987_v28, %v978_v53 }
 0x2c8   : > { %v996_v59 = vadd.f32 %v992_v55, %v963_v54  ;;  %v997_v60 = vadd.f32 %v993_v56, %v964_v45  ;;  %v1034_v62 = vpop.permute.xlu1 %1033 }
 0x2c9   : > { %v1037_v57 = vsel %vm892_vm15, %v1032_v44, %v1034_v62  ;;  %v1038_v58 = vsel %vm892_vm15, %v1034_v62, %v1036_v61 }
 0x2ca   : > { %v1012_v1 = vmul.f32 %v1003_v50, %v996_v59  ;;  %v1013_v2 = vmul.f32 %v1007_v51, %v997_v60  ;;  %v1041_v3 = vmul.f32 %v1037_v57, %v1010_v63  ;;  %v1042_v4 = vmul.f32 %v1038_v58, %v1011_v0 }
 0x2cc   : > { %v1043_v5 = vmul.f32 %v1037_v57, %v1012_v1  ;;  %v1044_v6 = vmul.f32 %v1038_v58, %v1013_v2  ;;  %v1045_v7 = vadd.f32 %v1042_v4, %v1041_v3 }
 0x2ce   : > { %1046 = vadd.xlane.f32.xlu1 %v1045_v7  ;;  %v1048_v8 = vadd.f32 %v1044_v6, %v1043_v5 }
 0x2d0   : > { %1049 = vadd.xlane.f32.xlu0 %v1048_v8 }
 0x2d4   : > { %1065 = vmax.xlane.f32.xlu0 %v1484_v20 }
 0x357   : > { %v1047_v10 = vpop.xlane.xlu1 %1046 }
 0x358   : > { %v1051_v13 = vadd.f32 %v1047_v10, %v1014_v9 }
 0x359   : > { %v1050_v16 = vpop.xlane.xlu0 %1049 }
 0x35a   : > { %1054 = vst.msk [vmem:[%s1520_s18] sm:$0xff] %vm441_vm1, %v1051_v13  ;;  %v1052_v12 = vadd.f32 %v1050_v16, %v1015_v11 }
 0x35c   : > { %1055 = vst.msk [vmem:[%s1520_s18 + $0x8] sm:$0xff] %vm441_vm1, %v1052_v12 }
 0x35d   : > { %v1066_v15 = vpop.xlane.xlu0 %1065 }
 0x35e   : > { %v1067_v20 = vmax.f32 %v1056_v14, %v1066_v15 }
 0x360   : > { %1069 = vst.msk [vmem:[%s435_s29] sm:$0x1] %vm444_vm4, %v1067_v20 }
 0x361 PF: > { %s21_s15 = sadd.s32 1, %s1317_s15   ;;  %s1590_s13 = smov %s1313_s14 }
 0x362   : > { %p18_p5 = scmp.ge.s32.totalorder %s21_s15, 4   ;;  %s1591_s14 = smov %s1593_s16 }
 0x364   :  { %20 = sbr.rel (!%p18_p5) target bundleno = 2 (0x2), region = 108 }

// kernel: how_forward_global.3
= control target key start
LH: loop header
LB: loop body
LE: loop exit
PB: predicated region body
PF: predicated region fallthrough
CT: control target
= control target key end

     0   :  { %s1057_s13 = smov 0   ;;  %s1059_s14 = smov 0   ;;  %s1166_s0 = inlined_call_operand.vmem [shape: bf16[2,36,80], index: 0, kind: input, shape index: {}]   ;;  %s1167_s1 = inlined_call_operand.vmem [shape: f32[2,1,80], index: 1, kind: input, shape index: {}]   ;;  %s1168_s2 = inlined_call_operand.vmem [shape: f32[2,1,64], index: 2, kind: input, shape index: {}]   ;;  %s1169_s3 = inlined_call_operand.vmem [shape: f32[1,64], index: 3, kind: input, shape index: {}]   ;;  %s1170_s4 = inlined_call_operand.vmem [shape: f32[1,64], index: 4, kind: input, shape index: {}]   ;;  %s1171_s5 = inlined_call_operand.vmem [shape: bf16[32,36], index: 5, kind: input, shape index: {}]   ;;  %s1172_s6 = inlined_call_operand.vmem [shape: f32[32,1], index: 6, kind: input, shape index: {}]   ;;  %s1173_s7 = inlined_call_operand.vmem [shape: bf16[16,32], index: 7, kind: input, shape index: {}]   ;;  %s1174_s8 = inlined_call_operand.vmem [shape: f32[16,1], index: 8, kind: input, shape index: {}]   ;;  %s1175_s9 = inlined_call_operand.vmem [shape: f32[2,16,1], index: 9, kind: output, shape index: {0}]   ;;  %s1176_s10 = inlined_call_operand.vmem [shape: f32[2,1,1], index: 10, kind: output, shape index: {1}]  }
   0x1   :  { %s1061_s15 = smov 0  }
   0x2 LB: > { %s33_s16 = sadd.s32 1, %s988_s14  ;;  %p881_p0 = scmp.ge.s32.totalorder %s992_s15, 1  ;;  %s992_s15 = sphi %s1061_s15, %s21_s15   ;;  %s988_s14 = sphi %s1059_s14, %s1178_s14   ;;  %s984_s13 = sphi %s1057_s13, %s1177_s13  }
   0x3   : > { %p35_p1 = scmp.ge.s32.totalorder %s33_s16, 2  ;;  %p355_p2 = scmp.lt.s32.totalorder %s992_s15, 3 }
   0x5   : > { %s1180_s16 = smov (%p35_p1, %s33_s16), 0  ;;  %p356_p3 = pnand %p881_p0, %p355_p2 }
   0x6   : > { %p406_p4 = scmp.lt.s32.totalorder (!%p356_p3), %s984_s13, 1  ;;  %s997_s26 = smov (!%p356_p3), 120  }
   0x7   : > { %359 = sbr.rel (%p356_p3) target bundleno = 1066 (0x42a), region = 56  ;;  %s998_s27 = smov (!%p356_p3), 112  }
   0x8   : > { %s1000_s29 = smov (!%p356_p3), 65   ;;  %s1001_s30 = smov (!%p356_p3), 127  }
   0xc   : > { %v965_v0 = vld [vmem:[%s1171_s5] sm:$0xff]   ;;  %vm499_vm0 = vcmask 293888   ;;  %s1182_s13 = smov (!%p406_p4, %s984_s13), 1  ;;  %v452_v1 = vld [vmem:[%s1172_s6 + $0x10] sm:$0xff]  ;;  %v994_v2 = vmov 0   ;;  %v453_v4 = vld [vmem:[%s1172_s6 + $0x18] sm:$0xff]  ;;  %v656_v50 = vlaneseq }
   0xd   : > { %914 = vmatprep.mubr.msk.bf16.mxu0 %vm499_vm0, %v965_v0  ;;  %960 = vset.pattern.permute.xlu0 %v994_v2  ;;  %v450_v3 = vld [vmem:[%s1172_s6] sm:$0xff]  ;;  %s927_s23 = smul.u32 20, %s1182_s13  ;;  %vm506_vm1 = vcmask 1041408   ;;  %v451_v5 = vld [vmem:[%s1172_s6 + $0x8] sm:$0xff]  ;;  %v995_v13 = vmov 0.0   ;;  %vm996_vm2 = vmmov 0   ;;  %s415_s25 = scalar_lea.vmem %s1167_s1, %s1182_s13 }
   0xe   : > { %466 = vperm.xlu0 %960, %v452_v1   ;;  %961 = vset.pattern.permute.xlu1 %v994_v2  ;;  %v593_v9 = vld [vmem:[%s1174_s8] sm:$0xff]  ;;  %v594_v10 = vld [vmem:[%s1174_s8 + $0x8] sm:$0xff]  ;;  %vm567_vm3 = vcmask 588864   ;;  %vm610_vm4 = vcmask 261120   ;;  %v657_v51 = vshrl.u32 %v656_v50, 7  ;;  %vm682_vm7 = vcmask 1048064  }
   0xf   : > { %456 = vperm.xlu1 %961, %v450_v3   ;;  %s410_s28 = scalar_lea.vmem %s1166_s0, %s927_s23  ;;  %v966_v12 = vld [vmem:[%s1171_s5 + $0x8] sm:$0xff]   ;;  %918 = vmatprep.subr.bf16.mxu1 %v995_v13  ;;  %v967_v39 = vld [vmem:[%s1173_s7] sm:$0xff]   ;;  %s899_s11 = sshll.u32 %s1182_s13, 4  ;;  %vm435_vm8 = vcmask 7168   ;;  %vm751_vm9 = vcmask 523264   ;;  %vm764_vm10 = vcmask 581696  }
  0x10   : > { %v962_v6 = vld [vmem:[%s410_s28 + $0x10] ss:$0 sps:$4 sm:$0x33]   ;;  %v963_v7 = vld [vmem:[%s410_s28 + $0x8] sm:$0xff]   ;;  %v964_v11 = vld [vmem:[%s410_s28] sm:$0xff]   ;;  %922 = vmatprep.mubr.msk.bf16.mxu1 %vm996_vm2, %v995_v13  ;;  %v658_v56 = vsub.s32 0, %v657_v51  ;;  %s1127_s18 = scalar_lea.vmem %s1175_s9, %s899_s11 }
  0x11   : > { %926 = vmatprep.subr.msk.bf16.mxu0 %vm506_vm1, %v962_v6  ;;  %v508_v8 = vsel %vm506_vm1, %v962_v6, 0  ;;  %v445_v54 = vld [vmem:[%s415_s25] sm:$0x1]  ;;  %s999_s28 = smov 64   ;;  %436 = vst.msk [vmem:[%s1127_s18] sm:$0xff] %vm435_vm8, %v995_v13  ;;  %437 = vst.msk [vmem:[%s1127_s18 + $0x8] sm:$0xff] %vm435_vm8, %v995_v13  ;;  %s420_s25 = scalar_lea.vmem %s1168_s2, %s1182_s13 }
  0x12   : > { %471 = vperm.xlu0 %960, %v453_v4   ;;  %909 = vmatpush3.bf16.msra.mxu0 %v508_v8  ;;  %v659_v61 = vrot.slane %v445_v54, %v658_v56  ;;  %vm438_vm11 = vcmask 0  }
  0x13   : > { %461 = vperm.xlu1 %961, %v451_v5   ;;  %910 = vmatprep.subr.bf16.mxu0 %v963_v7 }
  0x16   : > { %597 = vperm.xlu0 %960, %v593_v9   ;;  %911 = vmatpush3.bf16.msra.mxu0 %v963_v7 }
  0x17   : > { %602 = vperm.xlu1 %961, %v594_v10   ;;  %912 = vmatprep.subr.bf16.mxu0 %v964_v11 }
  0x18   : > { %v740_v51 = vld [vmem:[%s1127_s18 + $0x8] sm:$0xff] }
  0x1a   : > { %913 = vmatpush3.bf16.msra.mxu0 %v964_v11 }
  0x1d   : > { %915 = vmatmul.mubr.msk.bf16.vlgmr.msra.gmra.mxu0 %vm499_vm0, %v966_v12 }
  0x89   : > { %v467_v14 = vpop.permute.xlu0 %466 }
  0x8a   : > { %v457_v15 = vpop.permute.xlu1 %456 }
  0x8d   : > { %v472_v20 = vpop.permute.xlu0 %471 }
  0x8e   : > { %v462_v24 = vpop.permute.xlu1 %461 }
  0x91   : > { %v598_v62 = vpop.permute.xlu0 %597 }
  0x92   : > { %v603_v3 = vpop.permute.xlu1 %602 }
  0xdd   : > { %v916_v16 = vpop.f32.mrf.mxu0 }
  0xde   : > { %v553_v18 = vadd.f32 %v916_v16, %v467_v14 }
  0xdf   : > { %v544_v17 = vpop.f32.mrf.mxu0 }
  0xe0   : > { %v545_v19 = vadd.f32 %v544_v17, %v457_v15  ;;  %v561_v26 = vmax.f32 %v553_v18, 0.0 }
  0xe1   : > { %v917_v21 = vpop.f32.mrf.mxu0 }
  0xe2   : > { %v559_v22 = vmax.f32 %v545_v19, 0.0  ;;  %v556_v23 = vadd.f32 %v917_v21, %v472_v20  ;;  %v565_v32 = vmul.f32 %v561_v26, %v561_v26 }
  0xe3   : > { %v547_v25 = vpop.f32.mrf.mxu0 }
  0xe4   : > { %v562_v27 = vmax.f32 %v556_v23, 0.0  ;;  %v548_v28 = vadd.f32 %v547_v25, %v462_v24  ;;  %v563_v29 = vmul.f32 %v559_v22, %v559_v22  ;;  %v571_v40 = vsel %vm567_vm3, %v565_v32, 0.0  ;;  %v894_v25 = vld [vmem:[%s1169_s3] ss:$0 sm:$0xff] }
  0xe6   : > { %v560_v30 = vmax.f32 %v548_v28, 0.0  ;;  %v592_v31 = vpack.c.bf16 %v562_v27, %v561_v26  ;;  %v568_v34 = vsel %vm567_vm3, %v563_v29, 0.0  ;;  %v566_v35 = vmul.f32 %v562_v27, %v562_v27  ;;  %v895_v28 = vld [vmem:[%s1170_s4] ss:$0 sm:$0xff] }
  0xe8   : > { %v564_v33 = vmul.f32 %v560_v30, %v560_v30  ;;  %919 = vmatpush3.bf16.msra.mxu1 %v592_v31  ;;  %v591_v37 = vpack.c.bf16 %v560_v30, %v559_v22  ;;  %v573_v42 = vsel %vm567_vm3, %v566_v35, 0.0 }
  0xe9   : > { %920 = vmatprep.subr.bf16.mxu1 %v995_v13 }
  0xea   : > { %v569_v36 = vsel %vm567_vm3, %v564_v33, 0.0 }
  0xeb   : > { %v570_v38 = vadd.f32 %v569_v36, %v568_v34  ;;  %v896_v34 = vld [vmem:[%s420_s25] ss:$0 sm:$0xff] }
  0xec   : > { %921 = vmatpush3.bf16.msra.mxu1 %v591_v37 }
  0xed   : > { %v572_v41 = vadd.f32 %v571_v40, %v570_v38 }
  0xef   : > { %v574_v43 = vadd.f32 %v573_v42, %v572_v41  ;;  %923 = vmatmul.mubr.msk.bf16.vlgmr.msra.gmra.mxu1 %vm610_vm4, %v967_v39 }
  0xf1   : > { %v575_v44 = vrot.slane %v574_v43, 4 }
  0xf3   : > { %v576_v45 = vadd.f32 %v575_v44, %v574_v43 }
  0xf5   : > { %v577_v46 = vrot.slane %v576_v45, 2 }
  0xf7   : > { %v578_v47 = vadd.f32 %v577_v46, %v576_v45 }
  0xf9   : > { %v579_v48 = vrot.slane %v578_v47, 1 }
  0xfb   : > { %v580_v49 = vadd.f32 %v579_v48, %v578_v47  ;;  %v739_v48 = vld [vmem:[%s1127_s18] sm:$0xff] }
  0xfd   : > { %968 = vrsqrt.f32 %v580_v49  ;;  %vm583_vm5 = vcmp.eq.f32.partialorder %v580_v49, inf  ;;  %v586_v55 = vand.u32 2147483648, %v580_v49  ;;  %vm585_vm6 = vcmp.eq.f32.partialorder %v580_v49, 0.0 }
 0x10a   : > { %v969_v52 = vpop.eup %968 }
 0x10b   : > { %v582_v53 = vmul.f32 %v969_v52, %v580_v49 }
 0x10d   : > { %v584_v57 = vsel %vm583_vm5, %v580_v49, %v582_v53 }
 0x10e   : > { %v587_v58 = vsel %vm585_vm6, %v586_v55, %v584_v57 }
 0x10f   : > { %v1117_v59 = vmul.f32 %v587_v58, %v445_v54 }
 0x111   : > { %v744_v60 = vrot.slane %v1117_v59, %v658_v56  ;;  %v765_v47 = vsel %vm764_vm10, %v1117_v59, -inf }
 0x1af   : > { %v648_v63 = vpop.f32.mrf.mxu1 }
 0x1b0   : > { %v649_v0 = vadd.f32 %v648_v63, %v598_v62 }
 0x1b1   : > { %v924_v1 = vpop.f32.mrf.mxu1 }
 0x1b2   : > { %v661_v2 = vmul.f32 %v659_v61, %v649_v0 }
 0x1b3   : > { %v651_v4 = vpop.f32.mrf.mxu1 }
 0x1b4   : > { %v652_v5 = vadd.f32 %v651_v4, %v603_v3  ;;  %665 = vrot.lane.b32.xlu0 %v661_v2, %s997_s26 }
 0x1b5   : > { %v925_v6 = vpop.f32.mrf.mxu1 }
 0x1b6   : > { %v662_v7 = vmul.f32 %v659_v61, %v652_v5 }
 0x1b8   : > { %673 = vrot.lane.b32.xlu0 %v661_v2, %s998_s27  ;;  %667 = vrot.lane.b32.xlu1 %v662_v7, %s997_s26 }
 0x1bc   : > { %675 = vrot.lane.b32.xlu1 %v662_v7, %s998_s27 }
 0x226   : > { %v666_v8 = vpop.permute.xlu0 %665 }
 0x227   : > { %v671_v9 = vadd.f32 %v666_v8, %v661_v2 }
 0x22a   : > { %v674_v10 = vpop.permute.xlu0 %673  ;;  %v668_v11 = vpop.permute.xlu1 %667 }
 0x22b   : > { %v679_v12 = vadd.f32 %v674_v10, %v671_v9  ;;  %v672_v14 = vadd.f32 %v668_v11, %v662_v7 }
 0x22d   : > { %683 = vrot.lane.b32.xlu0 %v679_v12, %s999_s28 }
 0x22e   : > { %v676_v15 = vpop.permute.xlu1 %675 }
 0x22f   : > { %v680_v16 = vadd.f32 %v676_v15, %v672_v14 }
 0x231   : > { %686 = vrot.lane.b32.xlu1 %v680_v16, %s999_s28 }
 0x29f   : > { %v684_v17 = vpop.permute.xlu0 %683 }
 0x2a0   : > { %v685_v18 = vsel %vm682_vm7, %v684_v17, %v679_v12 }
 0x2a1   : > { %689 = vrot.lane.b32.xlu0 %v685_v18, %s999_s28 }
 0x2a3   : > { %v687_v19 = vpop.permute.xlu1 %686 }
 0x2a4   : > { %v688_v20 = vsel %vm682_vm7, %v687_v19, %v680_v16 }
 0x2a5   : > { %691 = vrot.lane.b32.xlu1 %v688_v20, %s999_s28  ;;  %s429_s28 = scalar_lea.vmem %s1176_s10, %s1182_s13 }
 0x2a6   : > { %439 = vst.msk [vmem:[%s429_s28] sm:$0x1] %vm438_vm11, %v995_v13 }
 0x2ad   : > { %v763_v54 = vld [vmem:[%s429_s28] sm:$0x1] }
 0x313   : > { %v690_v21 = vpop.permute.xlu0 %689 }
 0x314   : > { %v693_v22 = vsel %vm682_vm7, %v690_v21, %v679_v12 }
 0x315   : > { %703 = vrot.lane.b32.xlu0 %v693_v22, %s1000_s29 }
 0x317   : > { %v692_v23 = vpop.permute.xlu1 %691 }
 0x318   : > { %v694_v24 = vsel %vm682_vm7, %v692_v23, %v680_v16 }
 0x319   : > { %720 = vrot.lane.b32.xlu0 %v693_v22, %s1001_s30  ;;  %705 = vrot.lane.b32.xlu1 %v694_v24, %s1000_s29 }
 0x31d   : > { %722 = vrot.lane.b32.xlu1 %v694_v24, %s1001_s30  ;;  %746 = vrot.lane.b32.xlu0 %v744_v60, %s997_s26 }
 0x387   : > { %v704_v26 = vpop.permute.xlu0 %703 }
 0x388   : > { %v709_v27 = vmul.f32 %v894_v25, %v704_v26 }
 0x38a   : > { %v711_v31 = vadd.f32 %v709_v27, %v679_v12 }
 0x38b   : > { %v721_v29 = vpop.permute.xlu0 %720  ;;  %v706_v30 = vpop.permute.xlu1 %705 }
 0x38c   : > { %v726_v32 = vmul.f32 %v895_v28, %v721_v29  ;;  %v710_v33 = vmul.f32 %v894_v25, %v706_v30 }
 0x38e   : > { %v728_v35 = vadd.f32 %v726_v32, %v711_v31  ;;  %v712_v37 = vadd.f32 %v710_v33, %v680_v16 }
 0x38f   : > { %v723_v36 = vpop.permute.xlu1 %722  ;;  %v747_v40 = vpop.permute.xlu0 %746 }
 0x390   : > { %v727_v38 = vmul.f32 %v895_v28, %v723_v36  ;;  %v737_v39 = vmul.f32 %v896_v34, %v728_v35 }
 0x392   : > { %v729_v41 = vadd.f32 %v727_v38, %v712_v37  ;;  %v749_v42 = vmul.f32 %v747_v40, %v737_v39 }
 0x394   : > { %v738_v43 = vmul.f32 %v896_v34, %v729_v41  ;;  %v752_v44 = vsel %vm751_vm9, %v749_v42, 0.0 }
 0x395   : > { %753 = vadd.xlane.f32.xlu1 %v752_v44 }
 0x396   : > { %v750_v45 = vmul.f32 %v747_v40, %v738_v43 }
 0x398   : > { %v755_v46 = vsel %vm751_vm9, %v750_v45, 0.0 }
 0x399   : > { %756 = vadd.xlane.f32.xlu0 %v755_v46 }
 0x39d   : > { %766 = vmax.xlane.f32.xlu0 %v765_v47 }
 0x41e   : > { %v754_v49 = vpop.xlane.xlu1 %753 }
 0x41f   : > { %v758_v50 = vadd.f32 %v754_v49, %v739_v48 }
 0x421   : > { %761 = vst.msk [vmem:[%s1127_s18] sm:$0xff] %vm435_vm8, %v758_v50 }
 0x422   : > { %v757_v52 = vpop.xlane.xlu0 %756 }
 0x423   : > { %v759_v53 = vadd.f32 %v757_v52, %v740_v51 }
 0x425   : > { %762 = vst.msk [vmem:[%s1127_s18 + $0x8] sm:$0xff] %vm435_vm8, %v759_v53 }
 0x426   : > { %v767_v55 = vpop.xlane.xlu0 %766 }
 0x427   : > { %v768_v56 = vmax.f32 %v763_v54, %v767_v55 }
 0x429   : > { %770 = vst.msk [vmem:[%s429_s28] sm:$0x1] %vm438_vm11, %v768_v56 }
 0x42a PF: > { %s21_s15 = sadd.s32 1, %s992_s15   ;;  %s1177_s13 = smov %s988_s14 }
 0x42b   : > { %p18_p5 = scmp.ge.s32.totalorder %s21_s15, 4   ;;  %s1178_s14 = smov %s1180_s16 }
 0x42d   :  { %20 = sbr.rel (!%p18_p5) target bundleno = 2 (0x2), region = 108 }

</bundles_post_ra>
